<compile_context>
chip_gen: v5e
topology: v5e:2x2
jax: 0.10.0
libtpu: 0.0.40
codegen_flags: <defaults>
</compile_context>

<pallas_src>
import functools
import math

import jax
import jax.numpy as jnp
from jax.experimental import pallas as pl
from jax.experimental.pallas import tpu as pltpu


def _round_up(n, m):
    return ((n + m - 1) // m) * m


def _const_spec(shape):
    """BlockSpec for a weight that is identical for every grid step (VMEM resident)."""
    return pl.BlockSpec(shape, lambda b, _s=shape: tuple(0 for _ in _s))


# ----------------------------- Pallas kernels -----------------------------

def _encode_in_kernel(x_ref, w_ref, pe_ref, o_ref):
    # x_ref: (1, T, P), w_ref: (P, H), pe_ref: (1, 1, H) -> o_ref: (1, T, H)
    o_ref[0] = (jnp.dot(x_ref[0], w_ref[...], preferred_element_type=jnp.float32)
                + pe_ref[0])


def _transformer_layer_kernel(x_ref, in_w_ref, in_b_ref, out_w_ref, out_b_ref,
                              ff1_w_ref, ff1_b_ref, ff2_w_ref, ff2_b_ref,
                              ln1_g_ref, ln1_b_ref, ln2_g_ref, ln2_b_ref,
                              o_ref, *, nhead, eps=1e-5):
    """Post-norm TransformerEncoderLayer (relu, eval-mode dropout) on one batch row."""
    x = x_ref[0]                                  # (T, H)
    H = x.shape[-1]
    dh = H // nhead
    scale = 1.0 / math.sqrt(dh)

    qkv = (jnp.dot(x, in_w_ref[...], preferred_element_type=jnp.float32)
           + in_b_ref[...])                       # (T, 3H)
    ow = out_w_ref[...]                           # (H, H), loaded once

    attn = jnp.zeros_like(x)
    for head in range(nhead):
        lo = head * dh
        qh = qkv[:, lo:lo + dh]
        kh = qkv[:, H + lo:H + lo + dh]
        vh = qkv[:, 2 * H + lo:2 * H + lo + dh]
        # q @ k^T via dot_general (no explicit transpose / XLU relayout)
        s = jax.lax.dot_general(qh, kh, (((1,), (1,)), ((), ())),
                                preferred_element_type=jnp.float32) * scale
        s = s - jnp.max(s, axis=-1, keepdims=True)
        p = jnp.exp(s)
        p = p * pl.reciprocal(jnp.sum(p, axis=-1, keepdims=True), approx=True)
        oh = jnp.dot(p, vh, preferred_element_type=jnp.float32)     # (T, dh)
        # fold this head's slice of the output projection (avoids lane concat)
        attn = attn + jnp.dot(oh, ow[lo:lo + dh, :],
                              preferred_element_type=jnp.float32)
    attn = attn + out_b_ref[...]

    def ln(v, g, b):
        mean = jnp.mean(v, axis=-1, keepdims=True)
        var = jnp.mean(jnp.square(v - mean), axis=-1, keepdims=True)
        return (v - mean) * jax.lax.rsqrt(var + eps) * g + b

    r1 = ln(x + attn, ln1_g_ref[...], ln1_b_ref[...])
    hmid = jnp.maximum(
        jnp.dot(r1, ff1_w_ref[...], preferred_element_type=jnp.float32)
        + ff1_b_ref[...], 0.0)
    ff = (jnp.dot(hmid, ff2_w_ref[...], preferred_element_type=jnp.float32)
          + ff2_b_ref[...])
    o_ref[0] = ln(r1 + ff, ln2_g_ref[...], ln2_b_ref[...])


def _fsq_fused_kernel(h_ref, wi_ref, bi_ref, shift_ref, half_l_ref, offset_ref,
                      inv_half_w_ref, half_w_ref, basis_ref, wo_ref, bo_ref, pe_ref,
                      q_ref, idx_ref):
    """FSQ.project_in -> bound/round -> indices -> project_out (+ decoder PE add)."""
    h = h_ref[0]                                                        # (T, H)
    z = (jnp.dot(h, wi_ref[...], preferred_element_type=jnp.float32)
         + bi_ref[...])                                                 # (T, E)
    bounded = jnp.tanh(z + shift_ref[...]) * half_l_ref[...] - offset_ref[...]
    qz = jnp.round(bounded)                   # round_ste (forward only)
    codes = qz * inv_half_w_ref[...]          # normalized codes in [-1, 1]
    zhat = qz + half_w_ref[...]               # scale_and_shift(codes)
    idx_ref[0] = jnp.round(
        jnp.dot(zhat, basis_ref[...], preferred_element_type=jnp.float32)
    ).astype(jnp.int32)                                                 # (T, C_pad)
    q_ref[0] = (jnp.dot(codes, wo_ref[...], preferred_element_type=jnp.float32)
                + bo_ref[...] + pe_ref[0])                              # (T, H)


def _decode_out_kernel(d_ref, w_ref, b_ref, o_ref):
    # d_ref: (1, T, H), w_ref: (H, P_pad) zero-padded, b_ref: (1, P_pad)
    o_ref[0] = (jnp.dot(d_ref[0], w_ref[...], preferred_element_type=jnp.float32)
                + b_ref[...])


# ----------------------------- kernel wrappers -----------------------------

def encode_in(x_flat, w, pe):
    B, T, P = x_flat.shape
    H = w.shape[1]
    return pl.pallas_call(
        _encode_in_kernel,
        out_shape=jax.ShapeDtypeStruct((B, T, H), jnp.float32),
        grid=(B,),
        in_specs=[
            pl.BlockSpec((1, T, P), lambda b: (b, 0, 0)),
            _const_spec((P, H)),
            pl.BlockSpec((1, 1, H), lambda b: (b, 0, 0)),
        ],
        out_specs=pl.BlockSpec((1, T, H), lambda b: (b, 0, 0)),
        compiler_params=pltpu.CompilerParams(dimension_semantics=("parallel",)),
    )(x_flat, w, pe)


def transformer_layer(x, p, nhead):
    B, T, H = x.shape
    FF = p["ff1_w"].shape[1]
    return pl.pallas_call(
        functools.partial(_transformer_layer_kernel, nhead=nhead),
        out_shape=jax.ShapeDtypeStruct((B, T, H), jnp.float32),
        grid=(B,),
        in_specs=[
            pl.BlockSpec((1, T, H), lambda b: (b, 0, 0)),
            _const_spec((H, 3 * H)), _const_spec((1, 3 * H)),
            _const_spec((H, H)), _const_spec((1, H)),
            _const_spec((H, FF)), _const_spec((1, FF)),
            _const_spec((FF, H)), _const_spec((1, H)),
            _const_spec((1, H)), _const_spec((1, H)),
            _const_spec((1, H)), _const_spec((1, H)),
        ],
        out_specs=pl.BlockSpec((1, T, H), lambda b: (b, 0, 0)),
        compiler_params=pltpu.CompilerParams(dimension_semantics=("parallel",)),
    )(x,
      p["in_proj_w"], p["in_proj_b"].reshape(1, -1),
      p["out_proj_w"], p["out_proj_b"].reshape(1, -1),
      p["ff1_w"], p["ff1_b"].reshape(1, -1),
      p["ff2_w"], p["ff2_b"].reshape(1, -1),
      p["ln1_g"].reshape(1, -1), p["ln1_b"].reshape(1, -1),
      p["ln2_g"].reshape(1, -1), p["ln2_b"].reshape(1, -1))


def fsq_and_project(h, params, pe, num_codebooks):
    B, T, H = h.shape
    E = params["fsq_in_w"].shape[1]
    C_pad = params["fsq_basis_pad"].shape[1]
    q, idx = pl.pallas_call(
        _fsq_fused_kernel,
        out_shape=(jax.ShapeDtypeStruct((B, T, H), jnp.float32),
                   jax.ShapeDtypeStruct((B, T, C_pad), jnp.int32)),
        grid=(B,),
        in_specs=[
            pl.BlockSpec((1, T, H), lambda b: (b, 0, 0)),
            _const_spec((H, E)), _const_spec((1, E)),
            _const_spec((1, E)), _const_spec((1, E)), _const_spec((1, E)),
            _const_spec((1, E)), _const_spec((1, E)),
            _const_spec((E, C_pad)),
            _const_spec((E, H)), _const_spec((1, H)),
            pl.BlockSpec((1, 1, H), lambda b: (b, 0, 0)),
        ],
        out_specs=(pl.BlockSpec((1, T, H), lambda b: (b, 0, 0)),
                   pl.BlockSpec((1, T, C_pad), lambda b: (b, 0, 0))),
        compiler_params=pltpu.CompilerParams(dimension_semantics=("parallel",)),
    )(h,
      params["fsq_in_w"], params["fsq_in_b"].reshape(1, -1),
      params["fsq_shift"].reshape(1, -1), params["fsq_half_l"].reshape(1, -1),
      params["fsq_offset"].reshape(1, -1), params["fsq_inv_half_w"].reshape(1, -1),
      params["fsq_half_w"].reshape(1, -1), params["fsq_basis_pad"],
      params["fsq_out_w"], params["fsq_out_b"].reshape(1, -1), pe)
    return q, idx[:, :, :num_codebooks]


def decode_out(d, w_pad, b_pad, pose_flat):
    B, T, H = d.shape
    Np = w_pad.shape[1]
    out = pl.pallas_call(
        _decode_out_kernel,
        out_shape=jax.ShapeDtypeStruct((B, T, Np), jnp.float32),
        grid=(B,),
        in_specs=[
            pl.BlockSpec((1, T, H), lambda b: (b, 0, 0)),
            _const_spec((H, Np)),
            _const_spec((1, Np)),
        ],
        out_specs=pl.BlockSpec((1, T, Np), lambda b: (b, 0, 0)),
        compiler_params=pltpu.CompilerParams(dimension_semantics=("parallel",)),
    )(d, w_pad, b_pad.reshape(1, -1))
    return out[:, :, :pose_flat]


# ------------------------------ model glue --------------------------------

def estimate_levels(codebook_size: int):
    levels = {2 ** 4: [4, 4], 2 ** 8: [8, 6, 5], 2 ** 9: [4, 5, 5, 5],
              2 ** 10: [8, 5, 5, 5], 2 ** 11: [4, 4, 5, 5, 5],
              2 ** 12: [7, 5, 5, 5, 5], 2 ** 14: [8, 8, 8, 6, 5],
              2 ** 16: [8, 8, 8, 5, 5, 5]}
    if codebook_size in levels:
        return levels[codebook_size]
    raise ValueError("Codebook size not supported.")


def positional_encoding(n, d_model):
    position = jnp.arange(n, dtype=jnp.float32)[:, None]
    div_term = jnp.exp(jnp.arange(0, d_model, 2, dtype=jnp.float32)
                       * (-math.log(10000.0) / d_model))
    pe = jnp.zeros((n, 1, d_model), jnp.float32)
    pe = pe.at[:, 0, 0::2].set(jnp.sin(position * div_term))
    pe = pe.at[:, 0, 1::2].set(jnp.cos(position * div_term))
    return pe


def init_params(key, cfg):
    H, FF = cfg["hidden_dim"], cfg["dim_feedforward"]
    pose_flat = math.prod(cfg["pose_dims"])
    levels = cfg["levels"]
    C = cfg["num_codebooks"]
    Dc = len(levels)
    E = C * Dc
    keys = iter(jax.random.split(key, 1024))

    def dense(din, dout, scale=0.05):
        return jax.random.normal(next(keys), (din, dout), jnp.float32) * scale

    def bias(d):
        return jax.random.normal(next(keys), (d,), jnp.float32) * 0.01

    def layer_params():
        return dict(
            in_proj_w=dense(H, 3 * H), in_proj_b=bias(3 * H),
            out_proj_w=dense(H, H), out_proj_b=bias(H),
            ff1_w=dense(H, FF), ff1_b=bias(FF),
            ff2_w=dense(FF, H), ff2_b=bias(H),
            ln1_g=jnp.ones((H,), jnp.float32), ln1_b=jnp.zeros((H,), jnp.float32),
            ln2_g=jnp.ones((H,), jnp.float32), ln2_b=jnp.zeros((H,), jnp.float32),
        )

    # decoder output linear, zero-padded to a lane-dense (H, 128k) slab
    dec_out_w = dense(H, pose_flat, scale=0.1)
    dec_out_b = bias(pose_flat)
    P_pad = _round_up(pose_flat, 128)
    dec_out_w_pad = jnp.zeros((H, P_pad), jnp.float32).at[:, :pose_flat].set(dec_out_w)
    dec_out_b_pad = jnp.zeros((P_pad,), jnp.float32).at[:pose_flat].set(dec_out_b)

    params = dict(
        enc_in_w=dense(pose_flat, H, scale=0.1),                    # Linear(pose_flat, H, bias=False)
        enc_layers=[layer_params() for _ in range(cfg["num_layers"])],
        fsq_in_w=dense(H, E, scale=0.1), fsq_in_b=bias(E),          # FSQ.project_in
        fsq_out_w=dense(E, H, scale=0.1), fsq_out_b=bias(H),        # FSQ.project_out
        dec_layers=[layer_params() for _ in range(cfg["num_layers"])],
        dec_out_w_pad=dec_out_w_pad, dec_out_b_pad=dec_out_b_pad,
    )

    # FSQ constants (non-learned), tiled per codebook; eps folded into half_l.
    lv = jnp.array(levels, jnp.float32)
    eps = 1e-3
    half_l = (lv - 1.0) * (1.0 + eps) / 2.0
    offset = jnp.where(jnp.array(levels) % 2 == 0, 0.5, 0.0).astype(jnp.float32)
    shift = jnp.arctanh(offset / half_l)
    half_w = (jnp.array(levels) // 2).astype(jnp.float32)
    basis = jnp.concatenate([jnp.ones((1,), jnp.float32), jnp.cumprod(lv[:-1])])
    C_pad = _round_up(C, 128)                   # lane-dense indices output
    basis_pad = jnp.zeros((E, C_pad), jnp.float32)
    for c in range(C):
        basis_pad = basis_pad.at[c * Dc:(c + 1) * Dc, c].set(basis)
    params.update(
        fsq_half_l=jnp.tile(half_l, C), fsq_offset=jnp.tile(offset, C),
        fsq_shift=jnp.tile(shift, C), fsq_half_w=jnp.tile(half_w, C),
        fsq_inv_half_w=1.0 / jnp.tile(half_w, C),
        fsq_basis_pad=basis_pad,
    )
    return params


def pose_fsq_autoencoder_forward(params, x, cfg):
    B, T = x.shape[:2]
    H, nhead = cfg["hidden_dim"], cfg["nhead"]
    C = cfg["num_codebooks"]
    pose_flat = math.prod(cfg["pose_dims"])

    # PositionalEncoding adds pe[:x.size(0)] = pe[:B] (shape (B,1,H)) to a
    # batch-first tensor, i.e. it encodes the *batch* axis. Reproduced faithfully.
    pe = positional_encoding(B, H)                                  # (B, 1, H)

    # ----- encoder -----
    # TODO(synk): nn.Dropout(0.15) / PE dropout(0.1) / transformer dropouts are
    # train-time randomness; forward implemented in eval mode (identity).
    xf = x.reshape(B, T, pose_flat).astype(jnp.float32)             # nn.Flatten(start_dim=2)
    h = encode_in(xf, params["enc_in_w"], pe)                       # fused linear(no bias) + PE
    for lp in params["enc_layers"]:
        h = transformer_layer(h, lp, nhead)

    # ----- FSQ (fused project_in -> quantize -> indices -> project_out + dec PE) -----
    d, indices = fsq_and_project(h, params, pe, C)                  # (B,T,H), (B,T,C) int32

    # ----- decoder -----
    for lp in params["dec_layers"]:
        d = transformer_layer(d, lp, nhead)
    out = decode_out(d, params["dec_out_w_pad"], params["dec_out_b_pad"], pose_flat)
    out = out.reshape(B, T, *cfg["pose_dims"])                      # nn.Unflatten(dim=2)
    return out, indices


if __name__ == "__main__":
    cfg = dict(codebook_size=2 ** 8, pose_dims=(6, 3), num_codebooks=4,
               hidden_dim=32, nhead=4, dim_feedforward=64, num_layers=2)
    cfg["levels"] = estimate_levels(cfg["codebook_size"])           # [8, 6, 5]

    key = jax.random.PRNGKey(0)
    pkey, xkey = jax.random.split(key)
    params = init_params(pkey, cfg)

    B, T = 2, 8
    x = jax.random.normal(xkey, (B, T) + cfg["pose_dims"], jnp.float32)

    fwd = jax.jit(lambda p, xx: pose_fsq_autoencoder_forward(p, xx, cfg))
    out, indices = fwd(params, x)
    jax.block_until_ready((out, indices))

    assert out.shape == (B, T) + cfg["pose_dims"]
    assert indices.shape == (B, T, cfg["num_codebooks"])
    assert indices.dtype == jnp.int32
    assert bool(jnp.all(jnp.isfinite(out)))
    print("KERNEL_OK")
</pallas_src>

<mosaic_0001>
module attributes {stable_mosaic.version = 11 : i64} {
  func.func @_encode_in_kernel(%arg0: i32, %arg1: memref<1x8x18xf32, #tpu.memory_space<vmem>>, %arg2: memref<18x32xf32, #tpu.memory_space<vmem>>, %arg3: memref<1x1x32xf32, #tpu.memory_space<vmem>>, %arg4: memref<1x8x32xf32, #tpu.memory_space<vmem>>) attributes {dimension_semantics = [#tpu.dimension_semantics<parallel>], iteration_bounds = array<i64: 2>, scalar_prefetch = 0 : i64, scratch_operands = 0 : i64, tpu.core_type = #tpu.core_type<tc>, window_params = [{transform_indices = @transform_0, window_bounds = array<i64: 1, 8, 18>}, {pipeline_mode = #tpu.pipeline_mode<synchronous>, transform_indices = @transform_1, window_bounds = array<i64: 18, 32>}, {transform_indices = @transform_2, window_bounds = array<i64: 1, 1, 32>}, {transform_indices = @transform_3, window_bounds = array<i64: 1, 8, 32>}]} {
    %c0 = arith.constant 0 : index
    %c0_0 = arith.constant 0 : index
    %c0_1 = arith.constant 0 : index
    %0 = vector.load %arg1[%c0, %c0_0, %c0_1] : memref<1x8x18xf32, #tpu.memory_space<vmem>>, vector<1x8x18xf32>
    %1 = vector.shape_cast %0 : vector<1x8x18xf32> to vector<8x18xf32>
    %c0_2 = arith.constant 0 : index
    %c0_3 = arith.constant 0 : index
    %2 = vector.load %arg2[%c0_2, %c0_3] : memref<18x32xf32, #tpu.memory_space<vmem>>, vector<18x32xf32>
    %cst = arith.constant dense<0.000000e+00> : vector<8x32xf32>
    %3 = tpu.matmul %1, %2, %cst {dimension_numbers = #tpu.dot_dimension_numbers<[1], [0], [0], [1], [0, 0, 1, 1], [], []>} : vector<8x18xf32>, vector<18x32xf32>, vector<8x32xf32> -> vector<8x32xf32>
    %c0_4 = arith.constant 0 : index
    %c0_5 = arith.constant 0 : index
    %c0_6 = arith.constant 0 : index
    %4 = vector.load %arg3[%c0_4, %c0_5, %c0_6] : memref<1x1x32xf32, #tpu.memory_space<vmem>>, vector<1x1x32xf32>
    %5 = vector.shape_cast %4 : vector<1x1x32xf32> to vector<1x32xf32>
    %6 = vector.broadcast %5 : vector<1x32xf32> to vector<8x32xf32>
    %7 = arith.addf %3, %6 : vector<8x32xf32>
    %c0_7 = arith.constant 0 : index
    %c0_8 = arith.constant 0 : index
    %c0_9 = arith.constant 0 : index
    %8 = vector.load %arg4[%c0_7, %c0_8, %c0_9] : memref<1x8x32xf32, #tpu.memory_space<vmem>>, vector<1x8x32xf32>
    %9 = vector.shape_cast %8 : vector<1x8x32xf32> to vector<8x32xf32>
    %10 = vector.shape_cast %7 : vector<8x32xf32> to vector<1x8x32xf32>
    tpu.vector_store %arg4[%c0_7, %c0_8, %c0_9], %10 {strides = array<i32>} : memref<1x8x32xf32, #tpu.memory_space<vmem>>, vector<1x8x32xf32>,
    return
  }
  func.func @transform_0(%arg0: i32) -> (i32, i32, i32) {
    %c0_i32 = arith.constant 0 : i32
    %c0_i32_0 = arith.constant 0 : i32
    %c0_i32_1 = arith.constant 0 : i32
    return %arg0, %c0_i32, %c0_i32_0 : i32, i32, i32
  }
  func.func @transform_1(%arg0: i32) -> (i32, i32) {
    %c0_i32 = arith.constant 0 : i32
    %c0_i32_0 = arith.constant 0 : i32
    %c0_i32_1 = arith.constant 0 : i32
    return %c0_i32, %c0_i32_0 : i32, i32
  }
  func.func @transform_2(%arg0: i32) -> (i32, i32, i32) {
    %c0_i32 = arith.constant 0 : i32
    %c0_i32_0 = arith.constant 0 : i32
    %c0_i32_1 = arith.constant 0 : i32
    return %arg0, %c0_i32, %c0_i32_0 : i32, i32, i32
  }
  func.func @transform_3(%arg0: i32) -> (i32, i32, i32) {
    %c0_i32 = arith.constant 0 : i32
    %c0_i32_0 = arith.constant 0 : i32
    %c0_i32_1 = arith.constant 0 : i32
    return %arg0, %c0_i32, %c0_i32_0 : i32, i32, i32
  }
}

module attributes {stable_mosaic.version = 11 : i64} {
  func.func @_transformer_layer_kernel(%arg0: i32, %arg1: memref<1x8x32xf32, #tpu.memory_space<vmem>>, %arg2: memref<32x96xf32, #tpu.memory_space<vmem>>, %arg3: memref<1x96xf32, #tpu.memory_space<vmem>>, %arg4: memref<32x32xf32, #tpu.memory_space<vmem>>, %arg5: memref<1x32xf32, #tpu.memory_space<vmem>>, %arg6: memref<32x64xf32, #tpu.memory_space<vmem>>, %arg7: memref<1x64xf32, #tpu.memory_space<vmem>>, %arg8: memref<64x32xf32, #tpu.memory_space<vmem>>, %arg9: memref<1x32xf32, #tpu.memory_space<vmem>>, %arg10: memref<1x32xf32, #tpu.memory_space<vmem>>, %arg11: memref<1x32xf32, #tpu.memory_space<vmem>>, %arg12: memref<1x32xf32, #tpu.memory_space<vmem>>, %arg13: memref<1x32xf32, #tpu.memory_space<vmem>>, %arg14: memref<1x8x32xf32, #tpu.memory_space<vmem>>) attributes {dimension_semantics = [#tpu.dimension_semantics<parallel>], iteration_bounds = array<i64: 2>, scalar_prefetch = 0 : i64, scratch_operands = 0 : i64, tpu.core_type = #tpu.core_type<tc>, window_params = [{transform_indices = @transform_0, window_bounds = array<i64: 1, 8, 32>}, {pipeline_mode = #tpu.pipeline_mode<synchronous>, transform_indices = @transform_1, window_bounds = array<i64: 32, 96>}, {pipeline_mode = #tpu.pipeline_mode<synchronous>, transform_indices = @transform_2, window_bounds = array<i64: 1, 96>}, {pipeline_mode = #tpu.pipeline_mode<synchronous>, transform_indices = @transform_3, window_bounds = array<i64: 32, 32>}, {pipeline_mode = #tpu.pipeline_mode<synchronous>, transform_indices = @transform_4, window_bounds = array<i64: 1, 32>}, {pipeline_mode = #tpu.pipeline_mode<synchronous>, transform_indices = @transform_5, window_bounds = array<i64: 32, 64>}, {pipeline_mode = #tpu.pipeline_mode<synchronous>, transform_indices = @transform_6, window_bounds = array<i64: 1, 64>}, {pipeline_mode = #tpu.pipeline_mode<synchronous>, transform_indices = @transform_7, window_bounds = array<i64: 64, 32>}, {pipeline_mode = #tpu.pipeline_mode<synchronous>, transform_indices = @transform_8, window_bounds = array<i64: 1, 32>}, {pipeline_mode = #tpu.pipeline_mode<synchronous>, transform_indices = @transform_9, window_bounds = array<i64: 1, 32>}, {pipeline_mode = #tpu.pipeline_mode<synchronous>, transform_indices = @transform_10, window_bounds = array<i64: 1, 32>}, {pipeline_mode = #tpu.pipeline_mode<synchronous>, transform_indices = @transform_11, window_bounds = array<i64: 1, 32>}, {pipeline_mode = #tpu.pipeline_mode<synchronous>, transform_indices = @transform_12, window_bounds = array<i64: 1, 32>}, {transform_indices = @transform_13, window_bounds = array<i64: 1, 8, 32>}]} {
    %c0 = arith.constant 0 : index
    %c0_0 = arith.constant 0 : index
    %c0_1 = arith.constant 0 : index
    %0 = vector.load %arg1[%c0, %c0_0, %c0_1] : memref<1x8x32xf32, #tpu.memory_space<vmem>>, vector<1x8x32xf32>
    %1 = vector.shape_cast %0 : vector<1x8x32xf32> to vector<8x32xf32>
    %c0_2 = arith.constant 0 : index
    %c0_3 = arith.constant 0 : index
    %2 = vector.load %arg2[%c0_2, %c0_3] : memref<32x96xf32, #tpu.memory_space<vmem>>, vector<32x96xf32>
    %cst = arith.constant dense<0.000000e+00> : vector<8x96xf32>
    %3 = tpu.matmul %1, %2, %cst {dimension_numbers = #tpu.dot_dimension_numbers<[1], [0], [0], [1], [0, 0, 1, 1], [], []>} : vector<8x32xf32>, vector<32x96xf32>, vector<8x96xf32> -> vector<8x96xf32>
    %c0_4 = arith.constant 0 : index
    %c0_5 = arith.constant 0 : index
    %4 = vector.load %arg3[%c0_4, %c0_5] : memref<1x96xf32, #tpu.memory_space<vmem>>, vector<1x96xf32>
    %5 = vector.broadcast %4 : vector<1x96xf32> to vector<8x96xf32>
    %6 = arith.addf %3, %5 : vector<8x96xf32>
    %c0_6 = arith.constant 0 : index
    %c0_7 = arith.constant 0 : index
    %7 = vector.load %arg4[%c0_6, %c0_7] : memref<32x32xf32, #tpu.memory_space<vmem>>, vector<32x32xf32>
    %cst_8 = arith.constant 0.000000e+00 : f32
    %8 = vector.broadcast %cst_8 : f32 to vector<8x32xf32>
    %9 = vector.extract_strided_slice %6 {offsets = [0, 0], sizes = [8, 8], strides = [1, 1]} : vector<8x96xf32> to vector<8x8xf32>
    %10 = vector.extract_strided_slice %6 {offsets = [0, 32], sizes = [8, 8], strides = [1, 1]} : vector<8x96xf32> to vector<8x8xf32>
    %11 = vector.extract_strided_slice %6 {offsets = [0, 64], sizes = [8, 8], strides = [1, 1]} : vector<8x96xf32> to vector<8x8xf32>
    %cst_9 = arith.constant dense<0.000000e+00> : vector<8x8xf32>
    %12 = tpu.matmul %9, %10, %cst_9 {dimension_numbers = #tpu.dot_dimension_numbers<[1], [1], [0], [0], [0, 0, 1, 0], [], []>} : vector<8x8xf32>, vector<8x8xf32>, vector<8x8xf32> -> vector<8x8xf32>
    %cst_10 = arith.constant 0.353553385 : f32
    %13 = vector.broadcast %cst_10 : f32 to vector<8x8xf32>
    %14 = arith.mulf %12, %13 : vector<8x8xf32>
    %cst_11 = arith.constant dense<0xFF800000> : vector<8xf32>
    %15 = vector.multi_reduction <maximumf>, %14, %cst_11 [1] : vector<8x8xf32> to vector<8xf32>
    %16 = vector.shape_cast %15 : vector<8xf32> to vector<8x1xf32>
    %17 = vector.broadcast %16 : vector<8x1xf32> to vector<8x8xf32>
    %18 = arith.subf %14, %17 : vector<8x8xf32>
    %19 = math.exp %18 : vector<8x8xf32>
    %cst_12 = arith.constant dense<0.000000e+00> : vector<8xf32>
    %20 = vector.multi_reduction <add>, %19, %cst_12 [1] : vector<8x8xf32> to vector<8xf32>
    %21 = vector.shape_cast %20 : vector<8xf32> to vector<8x1xf32>
    %22 = tpu.reciprocal %21 {approx = true} : vector<8x1xf32> -> vector<8x1xf32>
    %23 = vector.broadcast %22 : vector<8x1xf32> to vector<8x8xf32>
    %24 = arith.mulf %19, %23 : vector<8x8xf32>
    %cst_13 = arith.constant dense<0.000000e+00> : vector<8x8xf32>
    %25 = tpu.matmul %24, %11, %cst_13 {dimension_numbers = #tpu.dot_dimension_numbers<[1], [0], [0], [1], [0, 0, 1, 1], [], []>} : vector<8x8xf32>, vector<8x8xf32>, vector<8x8xf32> -> vector<8x8xf32>
    %26 = vector.extract_strided_slice %7 {offsets = [0, 0], sizes = [8, 32], strides = [1, 1]} : vector<32x32xf32> to vector<8x32xf32>
    %cst_14 = arith.constant dense<0.000000e+00> : vector<8x32xf32>
    %27 = tpu.matmul %25, %26, %cst_14 {dimension_numbers = #tpu.dot_dimension_numbers<[1], [0], [0], [1], [0, 0, 1, 1], [], []>} : vector<8x8xf32>, vector<8x32xf32>, vector<8x32xf32> -> vector<8x32xf32>
    %28 = arith.addf %8, %27 : vector<8x32xf32>
    %29 = vector.extract_strided_slice %6 {offsets = [0, 8], sizes = [8, 8], strides = [1, 1]} : vector<8x96xf32> to vector<8x8xf32>
    %30 = vector.extract_strided_slice %6 {offsets = [0, 40], sizes = [8, 8], strides = [1, 1]} : vector<8x96xf32> to vector<8x8xf32>
    %31 = vector.extract_strided_slice %6 {offsets = [0, 72], sizes = [8, 8], strides = [1, 1]} : vector<8x96xf32> to vector<8x8xf32>
    %cst_15 = arith.constant dense<0.000000e+00> : vector<8x8xf32>
    %32 = tpu.matmul %29, %30, %cst_15 {dimension_numbers = #tpu.dot_dimension_numbers<[1], [1], [0], [0], [0, 0, 1, 0], [], []>} : vector<8x8xf32>, vector<8x8xf32>, vector<8x8xf32> -> vector<8x8xf32>
    %cst_16 = arith.constant 0.353553385 : f32
    %33 = vector.broadcast %cst_16 : f32 to vector<8x8xf32>
    %34 = arith.mulf %32, %33 : vector<8x8xf32>
    %cst_17 = arith.constant dense<0xFF800000> : vector<8xf32>
    %35 = vector.multi_reduction <maximumf>, %34, %cst_17 [1] : vector<8x8xf32> to vector<8xf32>
    %36 = vector.shape_cast %35 : vector<8xf32> to vector<8x1xf32>
    %37 = vector.broadcast %36 : vector<8x1xf32> to vector<8x8xf32>
    %38 = arith.subf %34, %37 : vector<8x8xf32>
    %39 = math.exp %38 : vector<8x8xf32>
    %cst_18 = arith.constant dense<0.000000e+00> : vector<8xf32>
    %40 = vector.multi_reduction <add>, %39, %cst_18 [1] : vector<8x8xf32> to vector<8xf32>
    %41 = vector.shape_cast %40 : vector<8xf32> to vector<8x1xf32>
    %42 = tpu.reciprocal %41 {approx = true} : vector<8x1xf32> -> vector<8x1xf32>
    %43 = vector.broadcast %42 : vector<8x1xf32> to vector<8x8xf32>
    %44 = arith.mulf %39, %43 : vector<8x8xf32>
    %cst_19 = arith.constant dense<0.000000e+00> : vector<8x8xf32>
    %45 = tpu.matmul %44, %31, %cst_19 {dimension_numbers = #tpu.dot_dimension_numbers<[1], [0], [0], [1], [0, 0, 1, 1], [], []>} : vector<8x8xf32>, vector<8x8xf32>, vector<8x8xf32> -> vector<8x8xf32>
    %46 = vector.extract_strided_slice %7 {offsets = [8, 0], sizes = [8, 32], strides = [1, 1]} : vector<32x32xf32> to vector<8x32xf32>
    %cst_20 = arith.constant dense<0.000000e+00> : vector<8x32xf32>
    %47 = tpu.matmul %45, %46, %cst_20 {dimension_numbers = #tpu.dot_dimension_numbers<[1], [0], [0], [1], [0, 0, 1, 1], [], []>} : vector<8x8xf32>, vector<8x32xf32>, vector<8x32xf32> -> vector<8x32xf32>
    %48 = arith.addf %28, %47 : vector<8x32xf32>
    %49 = vector.extract_strided_slice %6 {offsets = [0, 16], sizes = [8, 8], strides = [1, 1]} : vector<8x96xf32> to vector<8x8xf32>
    %50 = vector.extract_strided_slice %6 {offsets = [0, 48], sizes = [8, 8], strides = [1, 1]} : vector<8x96xf32> to vector<8x8xf32>
    %51 = vector.extract_strided_slice %6 {offsets = [0, 80], sizes = [8, 8], strides = [1, 1]} : vector<8x96xf32> to vector<8x8xf32>
    %cst_21 = arith.constant dense<0.000000e+00> : vector<8x8xf32>
    %52 = tpu.matmul %49, %50, %cst_21 {dimension_numbers = #tpu.dot_dimension_numbers<[1], [1], [0], [0], [0, 0, 1, 0], [], []>} : vector<8x8xf32>, vector<8x8xf32>, vector<8x8xf32> -> vector<8x8xf32>
    %cst_22 = arith.constant 0.353553385 : f32
    %53 = vector.broadcast %cst_22 : f32 to vector<8x8xf32>
    %54 = arith.mulf %52, %53 : vector<8x8xf32>
    %cst_23 = arith.constant dense<0xFF800000> : vector<8xf32>
    %55 = vector.multi_reduction <maximumf>, %54, %cst_23 [1] : vector<8x8xf32> to vector<8xf32>
    %56 = vector.shape_cast %55 : vector<8xf32> to vector<8x1xf32>
    %57 = vector.broadcast %56 : vector<8x1xf32> to vector<8x8xf32>
    %58 = arith.subf %54, %57 : vector<8x8xf32>
    %59 = math.exp %58 : vector<8x8xf32>
    %cst_24 = arith.constant dense<0.000000e+00> : vector<8xf32>
    %60 = vector.multi_reduction <add>, %59, %cst_24 [1] : vector<8x8xf32> to vector<8xf32>
    %61 = vector.shape_cast %60 : vector<8xf32> to vector<8x1xf32>
    %62 = tpu.reciprocal %61 {approx = true} : vector<8x1xf32> -> vector<8x1xf32>
    %63 = vector.broadcast %62 : vector<8x1xf32> to vector<8x8xf32>
    %64 = arith.mulf %59, %63 : vector<8x8xf32>
    %cst_25 = arith.constant dense<0.000000e+00> : vector<8x8xf32>
    %65 = tpu.matmul %64, %51, %cst_25 {dimension_numbers = #tpu.dot_dimension_numbers<[1], [0], [0], [1], [0, 0, 1, 1], [], []>} : vector<8x8xf32>, vector<8x8xf32>, vector<8x8xf32> -> vector<8x8xf32>
    %66 = vector.extract_strided_slice %7 {offsets = [16, 0], sizes = [8, 32], strides = [1, 1]} : vector<32x32xf32> to vector<8x32xf32>
    %cst_26 = arith.constant dense<0.000000e+00> : vector<8x32xf32>
    %67 = tpu.matmul %65, %66, %cst_26 {dimension_numbers = #tpu.dot_dimension_numbers<[1], [0], [0], [1], [0, 0, 1, 1], [], []>} : vector<8x8xf32>, vector<8x32xf32>, vector<8x32xf32> -> vector<8x32xf32>
    %68 = arith.addf %48, %67 : vector<8x32xf32>
    %69 = vector.extract_strided_slice %6 {offsets = [0, 24], sizes = [8, 8], strides = [1, 1]} : vector<8x96xf32> to vector<8x8xf32>
    %70 = vector.extract_strided_slice %6 {offsets = [0, 56], sizes = [8, 8], strides = [1, 1]} : vector<8x96xf32> to vector<8x8xf32>
    %71 = vector.extract_strided_slice %6 {offsets = [0, 88], sizes = [8, 8], strides = [1, 1]} : vector<8x96xf32> to vector<8x8xf32>
    %cst_27 = arith.constant dense<0.000000e+00> : vector<8x8xf32>
    %72 = tpu.matmul %69, %70, %cst_27 {dimension_numbers = #tpu.dot_dimension_numbers<[1], [1], [0], [0], [0, 0, 1, 0], [], []>} : vector<8x8xf32>, vector<8x8xf32>, vector<8x8xf32> -> vector<8x8xf32>
    %cst_28 = arith.constant 0.353553385 : f32
    %73 = vector.broadcast %cst_28 : f32 to vector<8x8xf32>
    %74 = arith.mulf %72, %73 : vector<8x8xf32>
    %cst_29 = arith.constant dense<0xFF800000> : vector<8xf32>
    %75 = vector.multi_reduction <maximumf>, %74, %cst_29 [1] : vector<8x8xf32> to vector<8xf32>
    %76 = vector.shape_cast %75 : vector<8xf32> to vector<8x1xf32>
    %77 = vector.broadcast %76 : vector<8x1xf32> to vector<8x8xf32>
    %78 = arith.subf %74, %77 : vector<8x8xf32>
    %79 = math.exp %78 : vector<8x8xf32>
    %cst_30 = arith.constant dense<0.000000e+00> : vector<8xf32>
    %80 = vector.multi_reduction <add>, %79, %cst_30 [1] : vector<8x8xf32> to vector<8xf32>
    %81 = vector.shape_cast %80 : vector<8xf32> to vector<8x1xf32>
    %82 = tpu.reciprocal %81 {approx = true} : vector<8x1xf32> -> vector<8x1xf32>
    %83 = vector.broadcast %82 : vector<8x1xf32> to vector<8x8xf32>
    %84 = arith.mulf %79, %83 : vector<8x8xf32>
    %cst_31 = arith.constant dense<0.000000e+00> : vector<8x8xf32>
    %85 = tpu.matmul %84, %71, %cst_31 {dimension_numbers = #tpu.dot_dimension_numbers<[1], [0], [0], [1], [0, 0, 1, 1], [], []>} : vector<8x8xf32>, vector<8x8xf32>, vector<8x8xf32> -> vector<8x8xf32>
    %86 = vector.extract_strided_slice %7 {offsets = [24, 0], sizes = [8, 32], strides = [1, 1]} : vector<32x32xf32> to vector<8x32xf32>
    %cst_32 = arith.constant dense<0.000000e+00> : vector<8x32xf32>
    %87 = tpu.matmul %85, %86, %cst_32 {dimension_numbers = #tpu.dot_dimension_numbers<[1], [0], [0], [1], [0, 0, 1, 1], [], []>} : vector<8x8xf32>, vector<8x32xf32>, vector<8x32xf32> -> vector<8x32xf32>
    %88 = arith.addf %68, %87 : vector<8x32xf32>
    %c0_33 = arith.constant 0 : index
    %c0_34 = arith.constant 0 : index
    %89 = vector.load %arg5[%c0_33, %c0_34] : memref<1x32xf32, #tpu.memory_space<vmem>>, vector<1x32xf32>
    %90 = vector.broadcast %89 : vector<1x32xf32> to vector<8x32xf32>
    %91 = arith.addf %88, %90 : vector<8x32xf32>
    %92 = arith.addf %1, %91 : vector<8x32xf32>
    %c0_35 = arith.constant 0 : index
    %c0_36 = arith.constant 0 : index
    %93 = vector.load %arg10[%c0_35, %c0_36] : memref<1x32xf32, #tpu.memory_space<vmem>>, vector<1x32xf32>
    %c0_37 = arith.constant 0 : index
    %c0_38 = arith.constant 0 : index
    %94 = vector.load %arg11[%c0_37, %c0_38] : memref<1x32xf32, #tpu.memory_space<vmem>>, vector<1x32xf32>
    %cst_39 = arith.constant dense<0.000000e+00> : vector<8xf32>
    %95 = vector.multi_reduction <add>, %92, %cst_39 [1] : vector<8x32xf32> to vector<8xf32>
    %96 = vector.shape_cast %95 : vector<8xf32> to vector<8x1xf32>
    %cst_40 = arith.constant 3.200000e+01 : f32
    %97 = vector.broadcast %cst_40 : f32 to vector<8x1xf32>
    %98 = arith.divf %96, %97 : vector<8x1xf32>
    %99 = vector.broadcast %98 : vector<8x1xf32> to vector<8x32xf32>
    %100 = arith.subf %92, %99 : vector<8x32xf32>
    %101 = arith.mulf %100, %100 : vector<8x32xf32>
    %cst_41 = arith.constant dense<0.000000e+00> : vector<8xf32>
    %102 = vector.multi_reduction <add>, %101, %cst_41 [1] : vector<8x32xf32> to vector<8xf32>
    %103 = vector.shape_cast %102 : vector<8xf32> to vector<8x1xf32>
    %cst_42 = arith.constant 3.200000e+01 : f32
    %104 = vector.broadcast %cst_42 : f32 to vector<8x1xf32>
    %105 = arith.divf %103, %104 : vector<8x1xf32>
    %106 = vector.broadcast %98 : vector<8x1xf32> to vector<8x32xf32>
    %107 = arith.subf %92, %106 : vector<8x32xf32>
    %cst_43 = arith.constant 9.99999974E-6 : f32
    %108 = vector.broadcast %cst_43 : f32 to vector<8x1xf32>
    %109 = arith.addf %105, %108 : vector<8x1xf32>
    %110 = math.rsqrt %109 : vector<8x1xf32>
    %111 = vector.broadcast %110 : vector<8x1xf32> to vector<8x32xf32>
    %112 = arith.mulf %107, %111 : vector<8x32xf32>
    %113 = vector.broadcast %93 : vector<1x32xf32> to vector<8x32xf32>
    %114 = arith.mulf %112, %113 : vector<8x32xf32>
    %115 = vector.broadcast %94 : vector<1x32xf32> to vector<8x32xf32>
    %116 = arith.addf %114, %115 : vector<8x32xf32>
    %c0_44 = arith.constant 0 : index
    %c0_45 = arith.constant 0 : index
    %117 = vector.load %arg6[%c0_44, %c0_45] : memref<32x64xf32, #tpu.memory_space<vmem>>, vector<32x64xf32>
    %cst_46 = arith.constant dense<0.000000e+00> : vector<8x64xf32>
    %118 = tpu.matmul %116, %117, %cst_46 {dimension_numbers = #tpu.dot_dimension_numbers<[1], [0], [0], [1], [0, 0, 1, 1], [], []>} : vector<8x32xf32>, vector<32x64xf32>, vector<8x64xf32> -> vector<8x64xf32>
    %c0_47 = arith.constant 0 : index
    %c0_48 = arith.constant 0 : index
    %119 = vector.load %arg7[%c0_47, %c0_48] : memref<1x64xf32, #tpu.memory_space<vmem>>, vector<1x64xf32>
    %120 = vector.broadcast %119 : vector<1x64xf32> to vector<8x64xf32>
    %121 = arith.addf %118, %120 : vector<8x64xf32>
    %cst_49 = arith.constant 0.000000e+00 : f32
    %122 = vector.broadcast %cst_49 : f32 to vector<8x64xf32>
    %123 = arith.maximumf %121, %122 : vector<8x64xf32>
    %c0_50 = arith.constant 0 : index
    %c0_51 = arith.constant 0 : index
    %124 = vector.load %arg8[%c0_50, %c0_51] : memref<64x32xf32, #tpu.memory_space<vmem>>, vector<64x32xf32>
    %cst_52 = arith.constant dense<0.000000e+00> : vector<8x32xf32>
    %125 = tpu.matmul %123, %124, %cst_52 {dimension_numbers = #tpu.dot_dimension_numbers<[1], [0], [0], [1], [0, 0, 1, 1], [], []>} : vector<8x64xf32>, vector<64x32xf32>, vector<8x32xf32> -> vector<8x32xf32>
    %c0_53 = arith.constant 0 : index
    %c0_54 = arith.constant 0 : index
    %126 = vector.load %arg9[%c0_53, %c0_54] : memref<1x32xf32, #tpu.memory_space<vmem>>, vector<1x32xf32>
    %127 = vector.broadcast %126 : vector<1x32xf32> to vector<8x32xf32>
    %128 = arith.addf %125, %127 : vector<8x32xf32>
    %129 = arith.addf %116, %128 : vector<8x32xf32>
    %c0_55 = arith.constant 0 : index
    %c0_56 = arith.constant 0 : index
    %130 = vector.load %arg12[%c0_55, %c0_56] : memref<1x32xf32, #tpu.memory_space<vmem>>, vector<1x32xf32>
    %c0_57 = arith.constant 0 : index
    %c0_58 = arith.constant 0 : index
    %131 = vector.load %arg13[%c0_57, %c0_58] : memref<1x32xf32, #tpu.memory_space<vmem>>, vector<1x32xf32>
    %cst_59 = arith.constant dense<0.000000e+00> : vector<8xf32>
    %132 = vector.multi_reduction <add>, %129, %cst_59 [1] : vector<8x32xf32> to vector<8xf32>
    %133 = vector.shape_cast %132 : vector<8xf32> to vector<8x1xf32>
    %cst_60 = arith.constant 3.200000e+01 : f32
    %134 = vector.broadcast %cst_60 : f32 to vector<8x1xf32>
    %135 = arith.divf %133, %134 : vector<8x1xf32>
    %136 = vector.broadcast %135 : vector<8x1xf32> to vector<8x32xf32>
    %137 = arith.subf %129, %136 : vector<8x32xf32>
    %138 = arith.mulf %137, %137 : vector<8x32xf32>
    %cst_61 = arith.constant dense<0.000000e+00> : vector<8xf32>
    %139 = vector.multi_reduction <add>, %138, %cst_61 [1] : vector<8x32xf32> to vector<8xf32>
    %140 = vector.shape_cast %139 : vector<8xf32> to vector<8x1xf32>
    %cst_62 = arith.constant 3.200000e+01 : f32
    %141 = vector.broadcast %cst_62 : f32 to vector<8x1xf32>
    %142 = arith.divf %140, %141 : vector<8x1xf32>
    %143 = vector.broadcast %135 : vector<8x1xf32> to vector<8x32xf32>
    %144 = arith.subf %129, %143 : vector<8x32xf32>
    %cst_63 = arith.constant 9.99999974E-6 : f32
    %145 = vector.broadcast %cst_63 : f32 to vector<8x1xf32>
    %146 = arith.addf %142, %145 : vector<8x1xf32>
    %147 = math.rsqrt %146 : vector<8x1xf32>
    %148 = vector.broadcast %147 : vector<8x1xf32> to vector<8x32xf32>
    %149 = arith.mulf %144, %148 : vector<8x32xf32>
    %150 = vector.broadcast %130 : vector<1x32xf32> to vector<8x32xf32>
    %151 = arith.mulf %149, %150 : vector<8x32xf32>
    %152 = vector.broadcast %131 : vector<1x32xf32> to vector<8x32xf32>
    %153 = arith.addf %151, %152 : vector<8x32xf32>
    %c0_64 = arith.constant 0 : index
    %c0_65 = arith.constant 0 : index
    %c0_66 = arith.constant 0 : index
    %154 = vector.load %arg14[%c0_64, %c0_65, %c0_66] : memref<1x8x32xf32, #tpu.memory_space<vmem>>, vector<1x8x32xf32>
    %155 = vector.shape_cast %154 : vector<1x8x32xf32> to vector<8x32xf32>
    %156 = vector.shape_cast %153 : vector<8x32xf32> to vector<1x8x32xf32>
    tpu.vector_store %arg14[%c0_64, %c0_65, %c0_66], %156 {strides = array<i32>} : memref<1x8x32xf32, #tpu.memory_space<vmem>>, vector<1x8x32xf32>,
    return
  }
  func.func @transform_0(%arg0: i32) -> (i32, i32, i32) {
    %c0_i32 = arith.constant 0 : i32
    %c0_i32_0 = arith.constant 0 : i32
    %c0_i32_1 = arith.constant 0 : i32
    return %arg0, %c0_i32, %c0_i32_0 : i32, i32, i32
  }
  func.func @transform_1(%arg0: i32) -> (i32, i32) {
    %c0_i32 = arith.constant 0 : i32
    %c0_i32_0 = arith.constant 0 : i32
    %c0_i32_1 = arith.constant 0 : i32
    return %c0_i32, %c0_i32_0 : i32, i32
  }
  func.func @transform_2(%arg0: i32) -> (i32, i32) {
    %c0_i32 = arith.constant 0 : i32
    %c0_i32_0 = arith.constant 0 : i32
    %c0_i32_1 = arith.constant 0 : i32
    return %c0_i32, %c0_i32_0 : i32, i32
  }
  func.func @transform_3(%arg0: i32) -> (i32, i32) {
    %c0_i32 = arith.constant 0 : i32
    %c0_i32_0 = arith.constant 0 : i32
    %c0_i32_1 = arith.constant 0 : i32
    return %c0_i32, %c0_i32_0 : i32, i32
  }
  func.func @transform_4(%arg0: i32) -> (i32, i32) {
    %c0_i32 = arith.constant 0 : i32
    %c0_i32_0 = arith.constant 0 : i32
    %c0_i32_1 = arith.constant 0 : i32
    return %c0_i32, %c0_i32_0 : i32, i32
  }
  func.func @transform_5(%arg0: i32) -> (i32, i32) {
    %c0_i32 = arith.constant 0 : i32
    %c0_i32_0 = arith.constant 0 : i32
    %c0_i32_1 = arith.constant 0 : i32
    return %c0_i32, %c0_i32_0 : i32, i32
  }
  func.func @transform_6(%arg0: i32) -> (i32, i32) {
    %c0_i32 = arith.constant 0 : i32
    %c0_i32_0 = arith.constant 0 : i32
    %c0_i32_1 = arith.constant 0 : i32
    return %c0_i32, %c0_i32_0 : i32, i32
  }
  func.func @transform_7(%arg0: i32) -> (i32, i32) {
    %c0_i32 = arith.constant 0 : i32
    %c0_i32_0 = arith.constant 0 : i32
    %c0_i32_1 = arith.constant 0 : i32
    return %c0_i32, %c0_i32_0 : i32, i32
  }
  func.func @transform_8(%arg0: i32) -> (i32, i32) {
    %c0_i32 = arith.constant 0 : i32
    %c0_i32_0 = arith.constant 0 : i32
    %c0_i32_1 = arith.constant 0 : i32
    return %c0_i32, %c0_i32_0 : i32, i32
  }
  func.func @transform_9(%arg0: i32) -> (i32, i32) {
    %c0_i32 = arith.constant 0 : i32
    %c0_i32_0 = arith.constant 0 : i32
    %c0_i32_1 = arith.constant 0 : i32
    return %c0_i32, %c0_i32_0 : i32, i32
  }
  func.func @transform_10(%arg0: i32) -> (i32, i32) {
    %c0_i32 = arith.constant 0 : i32
    %c0_i32_0 = arith.constant 0 : i32
    %c0_i32_1 = arith.constant 0 : i32
    return %c0_i32, %c0_i32_0 : i32, i32
  }
  func.func @transform_11(%arg0: i32) -> (i32, i32) {
    %c0_i32 = arith.constant 0 : i32
    %c0_i32_0 = arith.constant 0 : i32
    %c0_i32_1 = arith.constant 0 : i32
    return %c0_i32, %c0_i32_0 : i32, i32
  }
  func.func @transform_12(%arg0: i32) -> (i32, i32) {
    %c0_i32 = arith.constant 0 : i32
    %c0_i32_0 = arith.constant 0 : i32
    %c0_i32_1 = arith.constant 0 : i32
    return %c0_i32, %c0_i32_0 : i32, i32
  }
  func.func @transform_13(%arg0: i32) -> (i32, i32, i32) {
    %c0_i32 = arith.constant 0 : i32
    %c0_i32_0 = arith.constant 0 : i32
    %c0_i32_1 = arith.constant 0 : i32
    return %arg0, %c0_i32, %c0_i32_0 : i32, i32, i32
  }
}

module attributes {stable_mosaic.version = 11 : i64} {
  func.func @_fsq_fused_kernel(%arg0: i32, %arg1: memref<1x8x32xf32, #tpu.memory_space<vmem>>, %arg2: memref<32x12xf32, #tpu.memory_space<vmem>>, %arg3: memref<1x12xf32, #tpu.memory_space<vmem>>, %arg4: memref<1x12xf32, #tpu.memory_space<vmem>>, %arg5: memref<1x12xf32, #tpu.memory_space<vmem>>, %arg6: memref<1x12xf32, #tpu.memory_space<vmem>>, %arg7: memref<1x12xf32, #tpu.memory_space<vmem>>, %arg8: memref<1x12xf32, #tpu.memory_space<vmem>>, %arg9: memref<12x128xf32, #tpu.memory_space<vmem>>, %arg10: memref<12x32xf32, #tpu.memory_space<vmem>>, %arg11: memref<1x32xf32, #tpu.memory_space<vmem>>, %arg12: memref<1x1x32xf32, #tpu.memory_space<vmem>>, %arg13: memref<1x8x32xf32, #tpu.memory_space<vmem>>, %arg14: memref<1x8x128xi32, #tpu.memory_space<vmem>>) attributes {dimension_semantics = [#tpu.dimension_semantics<parallel>], iteration_bounds = array<i64: 2>, scalar_prefetch = 0 : i64, scratch_operands = 0 : i64, tpu.core_type = #tpu.core_type<tc>, window_params = [{transform_indices = @transform_0, window_bounds = array<i64: 1, 8, 32>}, {pipeline_mode = #tpu.pipeline_mode<synchronous>, transform_indices = @transform_1, window_bounds = array<i64: 32, 12>}, {pipeline_mode = #tpu.pipeline_mode<synchronous>, transform_indices = @transform_2, window_bounds = array<i64: 1, 12>}, {pipeline_mode = #tpu.pipeline_mode<synchronous>, transform_indices = @transform_3, window_bounds = array<i64: 1, 12>}, {pipeline_mode = #tpu.pipeline_mode<synchronous>, transform_indices = @transform_4, window_bounds = array<i64: 1, 12>}, {pipeline_mode = #tpu.pipeline_mode<synchronous>, transform_indices = @transform_5, window_bounds = array<i64: 1, 12>}, {pipeline_mode = #tpu.pipeline_mode<synchronous>, transform_indices = @transform_6, window_bounds = array<i64: 1, 12>}, {pipeline_mode = #tpu.pipeline_mode<synchronous>, transform_indices = @transform_7, window_bounds = array<i64: 1, 12>}, {pipeline_mode = #tpu.pipeline_mode<synchronous>, transform_indices = @transform_8, window_bounds = array<i64: 12, 128>}, {pipeline_mode = #tpu.pipeline_mode<synchronous>, transform_indices = @transform_9, window_bounds = array<i64: 12, 32>}, {pipeline_mode = #tpu.pipeline_mode<synchronous>, transform_indices = @transform_10, window_bounds = array<i64: 1, 32>}, {transform_indices = @transform_11, window_bounds = array<i64: 1, 1, 32>}, {transform_indices = @transform_12, window_bounds = array<i64: 1, 8, 32>}, {transform_indices = @transform_13, window_bounds = array<i64: 1, 8, 128>}]} {
    %c0 = arith.constant 0 : index
    %c0_0 = arith.constant 0 : index
    %c0_1 = arith.constant 0 : index
    %0 = vector.load %arg1[%c0, %c0_0, %c0_1] : memref<1x8x32xf32, #tpu.memory_space<vmem>>, vector<1x8x32xf32>
    %1 = vector.shape_cast %0 : vector<1x8x32xf32> to vector<8x32xf32>
    %c0_2 = arith.constant 0 : index
    %c0_3 = arith.constant 0 : index
    %2 = vector.load %arg2[%c0_2, %c0_3] : memref<32x12xf32, #tpu.memory_space<vmem>>, vector<32x12xf32>
    %cst = arith.constant dense<0.000000e+00> : vector<8x12xf32>
    %3 = tpu.matmul %1, %2, %cst {dimension_numbers = #tpu.dot_dimension_numbers<[1], [0], [0], [1], [0, 0, 1, 1], [], []>} : vector<8x32xf32>, vector<32x12xf32>, vector<8x12xf32> -> vector<8x12xf32>
    %c0_4 = arith.constant 0 : index
    %c0_5 = arith.constant 0 : index
    %4 = vector.load %arg3[%c0_4, %c0_5] : memref<1x12xf32, #tpu.memory_space<vmem>>, vector<1x12xf32>
    %5 = vector.broadcast %4 : vector<1x12xf32> to vector<8x12xf32>
    %6 = arith.addf %3, %5 : vector<8x12xf32>
    %c0_6 = arith.constant 0 : index
    %c0_7 = arith.constant 0 : index
    %7 = vector.load %arg4[%c0_6, %c0_7] : memref<1x12xf32, #tpu.memory_space<vmem>>, vector<1x12xf32>
    %8 = vector.broadcast %7 : vector<1x12xf32> to vector<8x12xf32>
    %9 = arith.addf %6, %8 : vector<8x12xf32>
    %10 = math.tanh %9 : vector<8x12xf32>
    %c0_8 = arith.constant 0 : index
    %c0_9 = arith.constant 0 : index
    %11 = vector.load %arg5[%c0_8, %c0_9] : memref<1x12xf32, #tpu.memory_space<vmem>>, vector<1x12xf32>
    %12 = vector.broadcast %11 : vector<1x12xf32> to vector<8x12xf32>
    %13 = arith.mulf %10, %12 : vector<8x12xf32>
    %c0_10 = arith.constant 0 : index
    %c0_11 = arith.constant 0 : index
    %14 = vector.load %arg6[%c0_10, %c0_11] : memref<1x12xf32, #tpu.memory_space<vmem>>, vector<1x12xf32>
    %15 = vector.broadcast %14 : vector<1x12xf32> to vector<8x12xf32>
    %16 = arith.subf %13, %15 : vector<8x12xf32>
    %17 = math.roundeven %16 : vector<8x12xf32>
    %c0_12 = arith.constant 0 : index
    %c0_13 = arith.constant 0 : index
    %18 = vector.load %arg7[%c0_12, %c0_13] : memref<1x12xf32, #tpu.memory_space<vmem>>, vector<1x12xf32>
    %19 = vector.broadcast %18 : vector<1x12xf32> to vector<8x12xf32>
    %20 = arith.mulf %17, %19 : vector<8x12xf32>
    %c0_14 = arith.constant 0 : index
    %c0_15 = arith.constant 0 : index
    %21 = vector.load %arg8[%c0_14, %c0_15] : memref<1x12xf32, #tpu.memory_space<vmem>>, vector<1x12xf32>
    %22 = vector.broadcast %21 : vector<1x12xf32> to vector<8x12xf32>
    %23 = arith.addf %17, %22 : vector<8x12xf32>
    %c0_16 = arith.constant 0 : index
    %c0_17 = arith.constant 0 : index
    %24 = vector.load %arg9[%c0_16, %c0_17] : memref<12x128xf32, #tpu.memory_space<vmem>>, vector<12x128xf32>
    %cst_18 = arith.constant dense<0.000000e+00> : vector<8x128xf32>
    %25 = tpu.matmul %23, %24, %cst_18 {dimension_numbers = #tpu.dot_dimension_numbers<[1], [0], [0], [1], [0, 0, 1, 1], [], []>} : vector<8x12xf32>, vector<12x128xf32>, vector<8x128xf32> -> vector<8x128xf32>
    %26 = math.roundeven %25 : vector<8x128xf32>
    %27 = arith.fptosi %26 : vector<8x128xf32> to vector<8x128xi32>
    %c0_19 = arith.constant 0 : index
    %c0_20 = arith.constant 0 : index
    %c0_21 = arith.constant 0 : index
    %28 = vector.load %arg14[%c0_19, %c0_20, %c0_21] : memref<1x8x128xi32, #tpu.memory_space<vmem>>, vector<1x8x128xi32>
    %29 = vector.shape_cast %28 : vector<1x8x128xi32> to vector<8x128xi32>
    %30 = vector.shape_cast %27 : vector<8x128xi32> to vector<1x8x128xi32>
    tpu.vector_store %arg14[%c0_19, %c0_20, %c0_21], %30 {strides = array<i32>} : memref<1x8x128xi32, #tpu.memory_space<vmem>>, vector<1x8x128xi32>,
    %c0_22 = arith.constant 0 : index
    %c0_23 = arith.constant 0 : index
    %31 = vector.load %arg10[%c0_22, %c0_23] : memref<12x32xf32, #tpu.memory_space<vmem>>, vector<12x32xf32>
    %cst_24 = arith.constant dense<0.000000e+00> : vector<8x32xf32>
    %32 = tpu.matmul %20, %31, %cst_24 {dimension_numbers = #tpu.dot_dimension_numbers<[1], [0], [0], [1], [0, 0, 1, 1], [], []>} : vector<8x12xf32>, vector<12x32xf32>, vector<8x32xf32> -> vector<8x32xf32>
    %c0_25 = arith.constant 0 : index
    %c0_26 = arith.constant 0 : index
    %33 = vector.load %arg11[%c0_25, %c0_26] : memref<1x32xf32, #tpu.memory_space<vmem>>, vector<1x32xf32>
    %34 = vector.broadcast %33 : vector<1x32xf32> to vector<8x32xf32>
    %35 = arith.addf %32, %34 : vector<8x32xf32>
    %c0_27 = arith.constant 0 : index
    %c0_28 = arith.constant 0 : index
    %c0_29 = arith.constant 0 : index
    %36 = vector.load %arg12[%c0_27, %c0_28, %c0_29] : memref<1x1x32xf32, #tpu.memory_space<vmem>>, vector<1x1x32xf32>
    %37 = vector.shape_cast %36 : vector<1x1x32xf32> to vector<1x32xf32>
    %38 = vector.broadcast %37 : vector<1x32xf32> to vector<8x32xf32>
    %39 = arith.addf %35, %38 : vector<8x32xf32>
    %c0_30 = arith.constant 0 : index
    %c0_31 = arith.constant 0 : index
    %c0_32 = arith.constant 0 : index
    %40 = vector.load %arg13[%c0_30, %c0_31, %c0_32] : memref<1x8x32xf32, #tpu.memory_space<vmem>>, vector<1x8x32xf32>
    %41 = vector.shape_cast %40 : vector<1x8x32xf32> to vector<8x32xf32>
    %42 = vector.shape_cast %39 : vector<8x32xf32> to vector<1x8x32xf32>
    tpu.vector_store %arg13[%c0_30, %c0_31, %c0_32], %42 {strides = array<i32>} : memref<1x8x32xf32, #tpu.memory_space<vmem>>, vector<1x8x32xf32>,
    return
  }
  func.func @transform_0(%arg0: i32) -> (i32, i32, i32) {
    %c0_i32 = arith.constant 0 : i32
    %c0_i32_0 = arith.constant 0 : i32
    %c0_i32_1 = arith.constant 0 : i32
    return %arg0, %c0_i32, %c0_i32_0 : i32, i32, i32
  }
  func.func @transform_1(%arg0: i32) -> (i32, i32) {
    %c0_i32 = arith.constant 0 : i32
    %c0_i32_0 = arith.constant 0 : i32
    %c0_i32_1 = arith.constant 0 : i32
    return %c0_i32, %c0_i32_0 : i32, i32
  }
  func.func @transform_2(%arg0: i32) -> (i32, i32) {
    %c0_i32 = arith.constant 0 : i32
    %c0_i32_0 = arith.constant 0 : i32
    %c0_i32_1 = arith.constant 0 : i32
    return %c0_i32, %c0_i32_0 : i32, i32
  }
  func.func @transform_3(%arg0: i32) -> (i32, i32) {
    %c0_i32 = arith.constant 0 : i32
    %c0_i32_0 = arith.constant 0 : i32
    %c0_i32_1 = arith.constant 0 : i32
    return %c0_i32, %c0_i32_0 : i32, i32
  }
  func.func @transform_4(%arg0: i32) -> (i32, i32) {
    %c0_i32 = arith.constant 0 : i32
    %c0_i32_0 = arith.constant 0 : i32
    %c0_i32_1 = arith.constant 0 : i32
    return %c0_i32, %c0_i32_0 : i32, i32
  }
  func.func @transform_5(%arg0: i32) -> (i32, i32) {
    %c0_i32 = arith.constant 0 : i32
    %c0_i32_0 = arith.constant 0 : i32
    %c0_i32_1 = arith.constant 0 : i32
    return %c0_i32, %c0_i32_0 : i32, i32
  }
  func.func @transform_6(%arg0: i32) -> (i32, i32) {
    %c0_i32 = arith.constant 0 : i32
    %c0_i32_0 = arith.constant 0 : i32
    %c0_i32_1 = arith.constant 0 : i32
    return %c0_i32, %c0_i32_0 : i32, i32
  }
  func.func @transform_7(%arg0: i32) -> (i32, i32) {
    %c0_i32 = arith.constant 0 : i32
    %c0_i32_0 = arith.constant 0 : i32
    %c0_i32_1 = arith.constant 0 : i32
    return %c0_i32, %c0_i32_0 : i32, i32
  }
  func.func @transform_8(%arg0: i32) -> (i32, i32) {
    %c0_i32 = arith.constant 0 : i32
    %c0_i32_0 = arith.constant 0 : i32
    %c0_i32_1 = arith.constant 0 : i32
    return %c0_i32, %c0_i32_0 : i32, i32
  }
  func.func @transform_9(%arg0: i32) -> (i32, i32) {
    %c0_i32 = arith.constant 0 : i32
    %c0_i32_0 = arith.constant 0 : i32
    %c0_i32_1 = arith.constant 0 : i32
    return %c0_i32, %c0_i32_0 : i32, i32
  }
  func.func @transform_10(%arg0: i32) -> (i32, i32) {
    %c0_i32 = arith.constant 0 : i32
    %c0_i32_0 = arith.constant 0 : i32
    %c0_i32_1 = arith.constant 0 : i32
    return %c0_i32, %c0_i32_0 : i32, i32
  }
  func.func @transform_11(%arg0: i32) -> (i32, i32, i32) {
    %c0_i32 = arith.constant 0 : i32
    %c0_i32_0 = arith.constant 0 : i32
    %c0_i32_1 = arith.constant 0 : i32
    return %arg0, %c0_i32, %c0_i32_0 : i32, i32, i32
  }
  func.func @transform_12(%arg0: i32) -> (i32, i32, i32) {
    %c0_i32 = arith.constant 0 : i32
    %c0_i32_0 = arith.constant 0 : i32
    %c0_i32_1 = arith.constant 0 : i32
    return %arg0, %c0_i32, %c0_i32_0 : i32, i32, i32
  }
  func.func @transform_13(%arg0: i32) -> (i32, i32, i32) {
    %c0_i32 = arith.constant 0 : i32
    %c0_i32_0 = arith.constant 0 : i32
    %c0_i32_1 = arith.constant 0 : i32
    return %arg0, %c0_i32, %c0_i32_0 : i32, i32, i32
  }
}

module attributes {stable_mosaic.version = 11 : i64} {
  func.func @_decode_out_kernel(%arg0: i32, %arg1: memref<1x8x32xf32, #tpu.memory_space<vmem>>, %arg2: memref<32x128xf32, #tpu.memory_space<vmem>>, %arg3: memref<1x128xf32, #tpu.memory_space<vmem>>, %arg4: memref<1x8x128xf32, #tpu.memory_space<vmem>>) attributes {dimension_semantics = [#tpu.dimension_semantics<parallel>], iteration_bounds = array<i64: 2>, scalar_prefetch = 0 : i64, scratch_operands = 0 : i64, tpu.core_type = #tpu.core_type<tc>, window_params = [{transform_indices = @transform_0, window_bounds = array<i64: 1, 8, 32>}, {pipeline_mode = #tpu.pipeline_mode<synchronous>, transform_indices = @transform_1, window_bounds = array<i64: 32, 128>}, {pipeline_mode = #tpu.pipeline_mode<synchronous>, transform_indices = @transform_2, window_bounds = array<i64: 1, 128>}, {transform_indices = @transform_3, window_bounds = array<i64: 1, 8, 128>}]} {
    %c0 = arith.constant 0 : index
    %c0_0 = arith.constant 0 : index
    %c0_1 = arith.constant 0 : index
    %0 = vector.load %arg1[%c0, %c0_0, %c0_1] : memref<1x8x32xf32, #tpu.memory_space<vmem>>, vector<1x8x32xf32>
    %1 = vector.shape_cast %0 : vector<1x8x32xf32> to vector<8x32xf32>
    %c0_2 = arith.constant 0 : index
    %c0_3 = arith.constant 0 : index
    %2 = vector.load %arg2[%c0_2, %c0_3] : memref<32x128xf32, #tpu.memory_space<vmem>>, vector<32x128xf32>
    %cst = arith.constant dense<0.000000e+00> : vector<8x128xf32>
    %3 = tpu.matmul %1, %2, %cst {dimension_numbers = #tpu.dot_dimension_numbers<[1], [0], [0], [1], [0, 0, 1, 1], [], []>} : vector<8x32xf32>, vector<32x128xf32>, vector<8x128xf32> -> vector<8x128xf32>
    %c0_4 = arith.constant 0 : index
    %c0_5 = arith.constant 0 : index
    %4 = vector.load %arg3[%c0_4, %c0_5] : memref<1x128xf32, #tpu.memory_space<vmem>>, vector<1x128xf32>
    %5 = vector.broadcast %4 : vector<1x128xf32> to vector<8x128xf32>
    %6 = arith.addf %3, %5 : vector<8x128xf32>
    %c0_6 = arith.constant 0 : index
    %c0_7 = arith.constant 0 : index
    %c0_8 = arith.constant 0 : index
    %7 = vector.load %arg4[%c0_6, %c0_7, %c0_8] : memref<1x8x128xf32, #tpu.memory_space<vmem>>, vector<1x8x128xf32>
    %8 = vector.shape_cast %7 : vector<1x8x128xf32> to vector<8x128xf32>
    %9 = vector.shape_cast %6 : vector<8x128xf32> to vector<1x8x128xf32>
    tpu.vector_store %arg4[%c0_6, %c0_7, %c0_8], %9 {strides = array<i32>} : memref<1x8x128xf32, #tpu.memory_space<vmem>>, vector<1x8x128xf32>,
    return
  }
  func.func @transform_0(%arg0: i32) -> (i32, i32, i32) {
    %c0_i32 = arith.constant 0 : i32
    %c0_i32_0 = arith.constant 0 : i32
    %c0_i32_1 = arith.constant 0 : i32
    return %arg0, %c0_i32, %c0_i32_0 : i32, i32, i32
  }
  func.func @transform_1(%arg0: i32) -> (i32, i32) {
    %c0_i32 = arith.constant 0 : i32
    %c0_i32_0 = arith.constant 0 : i32
    %c0_i32_1 = arith.constant 0 : i32
    return %c0_i32, %c0_i32_0 : i32, i32
  }
  func.func @transform_2(%arg0: i32) -> (i32, i32) {
    %c0_i32 = arith.constant 0 : i32
    %c0_i32_0 = arith.constant 0 : i32
    %c0_i32_1 = arith.constant 0 : i32
    return %c0_i32, %c0_i32_0 : i32, i32
  }
  func.func @transform_3(%arg0: i32) -> (i32, i32, i32) {
    %c0_i32 = arith.constant 0 : i32
    %c0_i32_0 = arith.constant 0 : i32
    %c0_i32_1 = arith.constant 0 : i32
    return %arg0, %c0_i32, %c0_i32_0 : i32, i32, i32
  }
}

module attributes {stable_mosaic.version = 11 : i64} {
  func.func @_transformer_layer_kernel(%arg0: i32, %arg1: memref<1x8x32xf32, #tpu.memory_space<vmem>>, %arg2: memref<32x96xf32, #tpu.memory_space<vmem>>, %arg3: memref<1x96xf32, #tpu.memory_space<vmem>>, %arg4: memref<32x32xf32, #tpu.memory_space<vmem>>, %arg5: memref<1x32xf32, #tpu.memory_space<vmem>>, %arg6: memref<32x64xf32, #tpu.memory_space<vmem>>, %arg7: memref<1x64xf32, #tpu.memory_space<vmem>>, %arg8: memref<64x32xf32, #tpu.memory_space<vmem>>, %arg9: memref<1x32xf32, #tpu.memory_space<vmem>>, %arg10: memref<1x32xf32, #tpu.memory_space<vmem>>, %arg11: memref<1x32xf32, #tpu.memory_space<vmem>>, %arg12: memref<1x32xf32, #tpu.memory_space<vmem>>, %arg13: memref<1x32xf32, #tpu.memory_space<vmem>>, %arg14: memref<1x8x32xf32, #tpu.memory_space<vmem>>) attributes {dimension_semantics = [#tpu.dimension_semantics<parallel>], iteration_bounds = array<i64: 2>, scalar_prefetch = 0 : i64, scratch_operands = 0 : i64, tpu.core_type = #tpu.core_type<tc>, window_params = [{transform_indices = @transform_0, window_bounds = array<i64: 1, 8, 32>}, {pipeline_mode = #tpu.pipeline_mode<synchronous>, transform_indices = @transform_1, window_bounds = array<i64: 32, 96>}, {pipeline_mode = #tpu.pipeline_mode<synchronous>, transform_indices = @transform_2, window_bounds = array<i64: 1, 96>}, {pipeline_mode = #tpu.pipeline_mode<synchronous>, transform_indices = @transform_3, window_bounds = array<i64: 32, 32>}, {pipeline_mode = #tpu.pipeline_mode<synchronous>, transform_indices = @transform_4, window_bounds = array<i64: 1, 32>}, {pipeline_mode = #tpu.pipeline_mode<synchronous>, transform_indices = @transform_5, window_bounds = array<i64: 32, 64>}, {pipeline_mode = #tpu.pipeline_mode<synchronous>, transform_indices = @transform_6, window_bounds = array<i64: 1, 64>}, {pipeline_mode = #tpu.pipeline_mode<synchronous>, transform_indices = @transform_7, window_bounds = array<i64: 64, 32>}, {pipeline_mode = #tpu.pipeline_mode<synchronous>, transform_indices = @transform_8, window_bounds = array<i64: 1, 32>}, {pipeline_mode = #tpu.pipeline_mode<synchronous>, transform_indices = @transform_9, window_bounds = array<i64: 1, 32>}, {pipeline_mode = #tpu.pipeline_mode<synchronous>, transform_indices = @transform_10, window_bounds = array<i64: 1, 32>}, {pipeline_mode = #tpu.pipeline_mode<synchronous>, transform_indices = @transform_11, window_bounds = array<i64: 1, 32>}, {pipeline_mode = #tpu.pipeline_mode<synchronous>, transform_indices = @transform_12, window_bounds = array<i64: 1, 32>}, {transform_indices = @transform_13, window_bounds = array<i64: 1, 8, 32>}]} {
    %c0 = arith.constant 0 : index
    %c0_0 = arith.constant 0 : index
    %c0_1 = arith.constant 0 : index
    %0 = vector.load %arg1[%c0, %c0_0, %c0_1] : memref<1x8x32xf32, #tpu.memory_space<vmem>>, vector<1x8x32xf32>
    %1 = vector.shape_cast %0 : vector<1x8x32xf32> to vector<8x32xf32>
    %c0_2 = arith.constant 0 : index
    %c0_3 = arith.constant 0 : index
    %2 = vector.load %arg2[%c0_2, %c0_3] : memref<32x96xf32, #tpu.memory_space<vmem>>, vector<32x96xf32>
    %cst = arith.constant dense<0.000000e+00> : vector<8x96xf32>
    %3 = tpu.matmul %1, %2, %cst {dimension_numbers = #tpu.dot_dimension_numbers<[1], [0], [0], [1], [0, 0, 1, 1], [], []>} : vector<8x32xf32>, vector<32x96xf32>, vector<8x96xf32> -> vector<8x96xf32>
    %c0_4 = arith.constant 0 : index
    %c0_5 = arith.constant 0 : index
    %4 = vector.load %arg3[%c0_4, %c0_5] : memref<1x96xf32, #tpu.memory_space<vmem>>, vector<1x96xf32>
    %5 = vector.broadcast %4 : vector<1x96xf32> to vector<8x96xf32>
    %6 = arith.addf %3, %5 : vector<8x96xf32>
    %c0_6 = arith.constant 0 : index
    %c0_7 = arith.constant 0 : index
    %7 = vector.load %arg4[%c0_6, %c0_7] : memref<32x32xf32, #tpu.memory_space<vmem>>, vector<32x32xf32>
    %cst_8 = arith.constant 0.000000e+00 : f32
    %8 = vector.broadcast %cst_8 : f32 to vector<8x32xf32>
    %9 = vector.extract_strided_slice %6 {offsets = [0, 0], sizes = [8, 8], strides = [1, 1]} : vector<8x96xf32> to vector<8x8xf32>
    %10 = vector.extract_strided_slice %6 {offsets = [0, 32], sizes = [8, 8], strides = [1, 1]} : vector<8x96xf32> to vector<8x8xf32>
    %11 = vector.extract_strided_slice %6 {offsets = [0, 64], sizes = [8, 8], strides = [1, 1]} : vector<8x96xf32> to vector<8x8xf32>
    %cst_9 = arith.constant dense<0.000000e+00> : vector<8x8xf32>
    %12 = tpu.matmul %9, %10, %cst_9 {dimension_numbers = #tpu.dot_dimension_numbers<[1], [1], [0], [0], [0, 0, 1, 0], [], []>} : vector<8x8xf32>, vector<8x8xf32>, vector<8x8xf32> -> vector<8x8xf32>
    %cst_10 = arith.constant 0.353553385 : f32
    %13 = vector.broadcast %cst_10 : f32 to vector<8x8xf32>
    %14 = arith.mulf %12, %13 : vector<8x8xf32>
    %cst_11 = arith.constant dense<0xFF800000> : vector<8xf32>
    %15 = vector.multi_reduction <maximumf>, %14, %cst_11 [1] : vector<8x8xf32> to vector<8xf32>
    %16 = vector.shape_cast %15 : vector<8xf32> to vector<8x1xf32>
    %17 = vector.broadcast %16 : vector<8x1xf32> to vector<8x8xf32>
    %18 = arith.subf %14, %17 : vector<8x8xf32>
    %19 = math.exp %18 : vector<8x8xf32>
    %cst_12 = arith.constant dense<0.000000e+00> : vector<8xf32>
    %20 = vector.multi_reduction <add>, %19, %cst_12 [1] : vector<8x8xf32> to vector<8xf32>
    %21 = vector.shape_cast %20 : vector<8xf32> to vector<8x1xf32>
    %22 = tpu.reciprocal %21 {approx = true} : vector<8x1xf32> -> vector<8x1xf32>
    %23 = vector.broadcast %22 : vector<8x1xf32> to vector<8x8xf32>
    %24 = arith.mulf %19, %23 : vector<8x8xf32>
    %cst_13 = arith.constant dense<0.000000e+00> : vector<8x8xf32>
    %25 = tpu.matmul %24, %11, %cst_13 {dimension_numbers = #tpu.dot_dimension_numbers<[1], [0], [0], [1], [0, 0, 1, 1], [], []>} : vector<8x8xf32>, vector<8x8xf32>, vector<8x8xf32> -> vector<8x8xf32>
    %26 = vector.extract_strided_slice %7 {offsets = [0, 0], sizes = [8, 32], strides = [1, 1]} : vector<32x32xf32> to vector<8x32xf32>
    %cst_14 = arith.constant dense<0.000000e+00> : vector<8x32xf32>
    %27 = tpu.matmul %25, %26, %cst_14 {dimension_numbers = #tpu.dot_dimension_numbers<[1], [0], [0], [1], [0, 0, 1, 1], [], []>} : vector<8x8xf32>, vector<8x32xf32>, vector<8x32xf32> -> vector<8x32xf32>
    %28 = arith.addf %8, %27 : vector<8x32xf32>
    %29 = vector.extract_strided_slice %6 {offsets = [0, 8], sizes = [8, 8], strides = [1, 1]} : vector<8x96xf32> to vector<8x8xf32>
    %30 = vector.extract_strided_slice %6 {offsets = [0, 40], sizes = [8, 8], strides = [1, 1]} : vector<8x96xf32> to vector<8x8xf32>
    %31 = vector.extract_strided_slice %6 {offsets = [0, 72], sizes = [8, 8], strides = [1, 1]} : vector<8x96xf32> to vector<8x8xf32>
    %cst_15 = arith.constant dense<0.000000e+00> : vector<8x8xf32>
    %32 = tpu.matmul %29, %30, %cst_15 {dimension_numbers = #tpu.dot_dimension_numbers<[1], [1], [0], [0], [0, 0, 1, 0], [], []>} : vector<8x8xf32>, vector<8x8xf32>, vector<8x8xf32> -> vector<8x8xf32>
    %cst_16 = arith.constant 0.353553385 : f32
    %33 = vector.broadcast %cst_16 : f32 to vector<8x8xf32>
    %34 = arith.mulf %32, %33 : vector<8x8xf32>
    %cst_17 = arith.constant dense<0xFF800000> : vector<8xf32>
    %35 = vector.multi_reduction <maximumf>, %34, %cst_17 [1] : vector<8x8xf32> to vector<8xf32>
    %36 = vector.shape_cast %35 : vector<8xf32> to vector<8x1xf32>
    %37 = vector.broadcast %36 : vector<8x1xf32> to vector<8x8xf32>
    %38 = arith.subf %34, %37 : vector<8x8xf32>
    %39 = math.exp %38 : vector<8x8xf32>
    %cst_18 = arith.constant dense<0.000000e+00> : vector<8xf32>
    %40 = vector.multi_reduction <add>, %39, %cst_18 [1] : vector<8x8xf32> to vector<8xf32>
    %41 = vector.shape_cast %40 : vector<8xf32> to vector<8x1xf32>
    %42 = tpu.reciprocal %41 {approx = true} : vector<8x1xf32> -> vector<8x1xf32>
    %43 = vector.broadcast %42 : vector<8x1xf32> to vector<8x8xf32>
    %44 = arith.mulf %39, %43 : vector<8x8xf32>
    %cst_19 = arith.constant dense<0.000000e+00> : vector<8x8xf32>
    %45 = tpu.matmul %44, %31, %cst_19 {dimension_numbers = #tpu.dot_dimension_numbers<[1], [0], [0], [1], [0, 0, 1, 1], [], []>} : vector<8x8xf32>, vector<8x8xf32>, vector<8x8xf32> -> vector<8x8xf32>
    %46 = vector.extract_strided_slice %7 {offsets = [8, 0], sizes = [8, 32], strides = [1, 1]} : vector<32x32xf32> to vector<8x32xf32>
    %cst_20 = arith.constant dense<0.000000e+00> : vector<8x32xf32>
    %47 = tpu.matmul %45, %46, %cst_20 {dimension_numbers = #tpu.dot_dimension_numbers<[1], [0], [0], [1], [0, 0, 1, 1], [], []>} : vector<8x8xf32>, vector<8x32xf32>, vector<8x32xf32> -> vector<8x32xf32>
    %48 = arith.addf %28, %47 : vector<8x32xf32>
    %49 = vector.extract_strided_slice %6 {offsets = [0, 16], sizes = [8, 8], strides = [1, 1]} : vector<8x96xf32> to vector<8x8xf32>
    %50 = vector.extract_strided_slice %6 {offsets = [0, 48], sizes = [8, 8], strides = [1, 1]} : vector<8x96xf32> to vector<8x8xf32>
    %51 = vector.extract_strided_slice %6 {offsets = [0, 80], sizes = [8, 8], strides = [1, 1]} : vector<8x96xf32> to vector<8x8xf32>
    %cst_21 = arith.constant dense<0.000000e+00> : vector<8x8xf32>
    %52 = tpu.matmul %49, %50, %cst_21 {dimension_numbers = #tpu.dot_dimension_numbers<[1], [1], [0], [0], [0, 0, 1, 0], [], []>} : vector<8x8xf32>, vector<8x8xf32>, vector<8x8xf32> -> vector<8x8xf32>
    %cst_22 = arith.constant 0.353553385 : f32
    %53 = vector.broadcast %cst_22 : f32 to vector<8x8xf32>
    %54 = arith.mulf %52, %53 : vector<8x8xf32>
    %cst_23 = arith.constant dense<0xFF800000> : vector<8xf32>
    %55 = vector.multi_reduction <maximumf>, %54, %cst_23 [1] : vector<8x8xf32> to vector<8xf32>
    %56 = vector.shape_cast %55 : vector<8xf32> to vector<8x1xf32>
    %57 = vector.broadcast %56 : vector<8x1xf32> to vector<8x8xf32>
    %58 = arith.subf %54, %57 : vector<8x8xf32>
    %59 = math.exp %58 : vector<8x8xf32>
    %cst_24 = arith.constant dense<0.000000e+00> : vector<8xf32>
    %60 = vector.multi_reduction <add>, %59, %cst_24 [1] : vector<8x8xf32> to vector<8xf32>
    %61 = vector.shape_cast %60 : vector<8xf32> to vector<8x1xf32>
    %62 = tpu.reciprocal %61 {approx = true} : vector<8x1xf32> -> vector<8x1xf32>
    %63 = vector.broadcast %62 : vector<8x1xf32> to vector<8x8xf32>
    %64 = arith.mulf %59, %63 : vector<8x8xf32>
    %cst_25 = arith.constant dense<0.000000e+00> : vector<8x8xf32>
    %65 = tpu.matmul %64, %51, %cst_25 {dimension_numbers = #tpu.dot_dimension_numbers<[1], [0], [0], [1], [0, 0, 1, 1], [], []>} : vector<8x8xf32>, vector<8x8xf32>, vector<8x8xf32> -> vector<8x8xf32>
    %66 = vector.extract_strided_slice %7 {offsets = [16, 0], sizes = [8, 32], strides = [1, 1]} : vector<32x32xf32> to vector<8x32xf32>
    %cst_26 = arith.constant dense<0.000000e+00> : vector<8x32xf32>
    %67 = tpu.matmul %65, %66, %cst_26 {dimension_numbers = #tpu.dot_dimension_numbers<[1], [0], [0], [1], [0, 0, 1, 1], [], []>} : vector<8x8xf32>, vector<8x32xf32>, vector<8x32xf32> -> vector<8x32xf32>
    %68 = arith.addf %48, %67 : vector<8x32xf32>
    %69 = vector.extract_strided_slice %6 {offsets = [0, 24], sizes = [8, 8], strides = [1, 1]} : vector<8x96xf32> to vector<8x8xf32>
    %70 = vector.extract_strided_slice %6 {offsets = [0, 56], sizes = [8, 8], strides = [1, 1]} : vector<8x96xf32> to vector<8x8xf32>
    %71 = vector.extract_strided_slice %6 {offsets = [0, 88], sizes = [8, 8], strides = [1, 1]} : vector<8x96xf32> to vector<8x8xf32>
    %cst_27 = arith.constant dense<0.000000e+00> : vector<8x8xf32>
    %72 = tpu.matmul %69, %70, %cst_27 {dimension_numbers = #tpu.dot_dimension_numbers<[1], [1], [0], [0], [0, 0, 1, 0], [], []>} : vector<8x8xf32>, vector<8x8xf32>, vector<8x8xf32> -> vector<8x8xf32>
    %cst_28 = arith.constant 0.353553385 : f32
    %73 = vector.broadcast %cst_28 : f32 to vector<8x8xf32>
    %74 = arith.mulf %72, %73 : vector<8x8xf32>
    %cst_29 = arith.constant dense<0xFF800000> : vector<8xf32>
    %75 = vector.multi_reduction <maximumf>, %74, %cst_29 [1] : vector<8x8xf32> to vector<8xf32>
    %76 = vector.shape_cast %75 : vector<8xf32> to vector<8x1xf32>
    %77 = vector.broadcast %76 : vector<8x1xf32> to vector<8x8xf32>
    %78 = arith.subf %74, %77 : vector<8x8xf32>
    %79 = math.exp %78 : vector<8x8xf32>
    %cst_30 = arith.constant dense<0.000000e+00> : vector<8xf32>
    %80 = vector.multi_reduction <add>, %79, %cst_30 [1] : vector<8x8xf32> to vector<8xf32>
    %81 = vector.shape_cast %80 : vector<8xf32> to vector<8x1xf32>
    %82 = tpu.reciprocal %81 {approx = true} : vector<8x1xf32> -> vector<8x1xf32>
    %83 = vector.broadcast %82 : vector<8x1xf32> to vector<8x8xf32>
    %84 = arith.mulf %79, %83 : vector<8x8xf32>
    %cst_31 = arith.constant dense<0.000000e+00> : vector<8x8xf32>
    %85 = tpu.matmul %84, %71, %cst_31 {dimension_numbers = #tpu.dot_dimension_numbers<[1], [0], [0], [1], [0, 0, 1, 1], [], []>} : vector<8x8xf32>, vector<8x8xf32>, vector<8x8xf32> -> vector<8x8xf32>
    %86 = vector.extract_strided_slice %7 {offsets = [24, 0], sizes = [8, 32], strides = [1, 1]} : vector<32x32xf32> to vector<8x32xf32>
    %cst_32 = arith.constant dense<0.000000e+00> : vector<8x32xf32>
    %87 = tpu.matmul %85, %86, %cst_32 {dimension_numbers = #tpu.dot_dimension_numbers<[1], [0], [0], [1], [0, 0, 1, 1], [], []>} : vector<8x8xf32>, vector<8x32xf32>, vector<8x32xf32> -> vector<8x32xf32>
    %88 = arith.addf %68, %87 : vector<8x32xf32>
    %c0_33 = arith.constant 0 : index
    %c0_34 = arith.constant 0 : index
    %89 = vector.load %arg5[%c0_33, %c0_34] : memref<1x32xf32, #tpu.memory_space<vmem>>, vector<1x32xf32>
    %90 = vector.broadcast %89 : vector<1x32xf32> to vector<8x32xf32>
    %91 = arith.addf %88, %90 : vector<8x32xf32>
    %92 = arith.addf %1, %91 : vector<8x32xf32>
    %c0_35 = arith.constant 0 : index
    %c0_36 = arith.constant 0 : index
    %93 = vector.load %arg10[%c0_35, %c0_36] : memref<1x32xf32, #tpu.memory_space<vmem>>, vector<1x32xf32>
    %c0_37 = arith.constant 0 : index
    %c0_38 = arith.constant 0 : index
    %94 = vector.load %arg11[%c0_37, %c0_38] : memref<1x32xf32, #tpu.memory_space<vmem>>, vector<1x32xf32>
    %cst_39 = arith.constant dense<0.000000e+00> : vector<8xf32>
    %95 = vector.multi_reduction <add>, %92, %cst_39 [1] : vector<8x32xf32> to vector<8xf32>
    %96 = vector.shape_cast %95 : vector<8xf32> to vector<8x1xf32>
    %cst_40 = arith.constant 3.200000e+01 : f32
    %97 = vector.broadcast %cst_40 : f32 to vector<8x1xf32>
    %98 = arith.divf %96, %97 : vector<8x1xf32>
    %99 = vector.broadcast %98 : vector<8x1xf32> to vector<8x32xf32>
    %100 = arith.subf %92, %99 : vector<8x32xf32>
    %101 = arith.mulf %100, %100 : vector<8x32xf32>
    %cst_41 = arith.constant dense<0.000000e+00> : vector<8xf32>
    %102 = vector.multi_reduction <add>, %101, %cst_41 [1] : vector<8x32xf32> to vector<8xf32>
    %103 = vector.shape_cast %102 : vector<8xf32> to vector<8x1xf32>
    %cst_42 = arith.constant 3.200000e+01 : f32
    %104 = vector.broadcast %cst_42 : f32 to vector<8x1xf32>
    %105 = arith.divf %103, %104 : vector<8x1xf32>
    %106 = vector.broadcast %98 : vector<8x1xf32> to vector<8x32xf32>
    %107 = arith.subf %92, %106 : vector<8x32xf32>
    %cst_43 = arith.constant 9.99999974E-6 : f32
    %108 = vector.broadcast %cst_43 : f32 to vector<8x1xf32>
    %109 = arith.addf %105, %108 : vector<8x1xf32>
    %110 = math.rsqrt %109 : vector<8x1xf32>
    %111 = vector.broadcast %110 : vector<8x1xf32> to vector<8x32xf32>
    %112 = arith.mulf %107, %111 : vector<8x32xf32>
    %113 = vector.broadcast %93 : vector<1x32xf32> to vector<8x32xf32>
    %114 = arith.mulf %112, %113 : vector<8x32xf32>
    %115 = vector.broadcast %94 : vector<1x32xf32> to vector<8x32xf32>
    %116 = arith.addf %114, %115 : vector<8x32xf32>
    %c0_44 = arith.constant 0 : index
    %c0_45 = arith.constant 0 : index
    %117 = vector.load %arg6[%c0_44, %c0_45] : memref<32x64xf32, #tpu.memory_space<vmem>>, vector<32x64xf32>
    %cst_46 = arith.constant dense<0.000000e+00> : vector<8x64xf32>
    %118 = tpu.matmul %116, %117, %cst_46 {dimension_numbers = #tpu.dot_dimension_numbers<[1], [0], [0], [1], [0, 0, 1, 1], [], []>} : vector<8x32xf32>, vector<32x64xf32>, vector<8x64xf32> -> vector<8x64xf32>
    %c0_47 = arith.constant 0 : index
    %c0_48 = arith.constant 0 : index
    %119 = vector.load %arg7[%c0_47, %c0_48] : memref<1x64xf32, #tpu.memory_space<vmem>>, vector<1x64xf32>
    %120 = vector.broadcast %119 : vector<1x64xf32> to vector<8x64xf32>
    %121 = arith.addf %118, %120 : vector<8x64xf32>
    %cst_49 = arith.constant 0.000000e+00 : f32
    %122 = vector.broadcast %cst_49 : f32 to vector<8x64xf32>
    %123 = arith.maximumf %121, %122 : vector<8x64xf32>
    %c0_50 = arith.constant 0 : index
    %c0_51 = arith.constant 0 : index
    %124 = vector.load %arg8[%c0_50, %c0_51] : memref<64x32xf32, #tpu.memory_space<vmem>>, vector<64x32xf32>
    %cst_52 = arith.constant dense<0.000000e+00> : vector<8x32xf32>
    %125 = tpu.matmul %123, %124, %cst_52 {dimension_numbers = #tpu.dot_dimension_numbers<[1], [0], [0], [1], [0, 0, 1, 1], [], []>} : vector<8x64xf32>, vector<64x32xf32>, vector<8x32xf32> -> vector<8x32xf32>
    %c0_53 = arith.constant 0 : index
    %c0_54 = arith.constant 0 : index
    %126 = vector.load %arg9[%c0_53, %c0_54] : memref<1x32xf32, #tpu.memory_space<vmem>>, vector<1x32xf32>
    %127 = vector.broadcast %126 : vector<1x32xf32> to vector<8x32xf32>
    %128 = arith.addf %125, %127 : vector<8x32xf32>
    %129 = arith.addf %116, %128 : vector<8x32xf32>
    %c0_55 = arith.constant 0 : index
    %c0_56 = arith.constant 0 : index
    %130 = vector.load %arg12[%c0_55, %c0_56] : memref<1x32xf32, #tpu.memory_space<vmem>>, vector<1x32xf32>
    %c0_57 = arith.constant 0 : index
    %c0_58 = arith.constant 0 : index
    %131 = vector.load %arg13[%c0_57, %c0_58] : memref<1x32xf32, #tpu.memory_space<vmem>>, vector<1x32xf32>
    %cst_59 = arith.constant dense<0.000000e+00> : vector<8xf32>
    %132 = vector.multi_reduction <add>, %129, %cst_59 [1] : vector<8x32xf32> to vector<8xf32>
    %133 = vector.shape_cast %132 : vector<8xf32> to vector<8x1xf32>
    %cst_60 = arith.constant 3.200000e+01 : f32
    %134 = vector.broadcast %cst_60 : f32 to vector<8x1xf32>
    %135 = arith.divf %133, %134 : vector<8x1xf32>
    %136 = vector.broadcast %135 : vector<8x1xf32> to vector<8x32xf32>
    %137 = arith.subf %129, %136 : vector<8x32xf32>
    %138 = arith.mulf %137, %137 : vector<8x32xf32>
    %cst_61 = arith.constant dense<0.000000e+00> : vector<8xf32>
    %139 = vector.multi_reduction <add>, %138, %cst_61 [1] : vector<8x32xf32> to vector<8xf32>
    %140 = vector.shape_cast %139 : vector<8xf32> to vector<8x1xf32>
    %cst_62 = arith.constant 3.200000e+01 : f32
    %141 = vector.broadcast %cst_62 : f32 to vector<8x1xf32>
    %142 = arith.divf %140, %141 : vector<8x1xf32>
    %143 = vector.broadcast %135 : vector<8x1xf32> to vector<8x32xf32>
    %144 = arith.subf %129, %143 : vector<8x32xf32>
    %cst_63 = arith.constant 9.99999974E-6 : f32
    %145 = vector.broadcast %cst_63 : f32 to vector<8x1xf32>
    %146 = arith.addf %142, %145 : vector<8x1xf32>
    %147 = math.rsqrt %146 : vector<8x1xf32>
    %148 = vector.broadcast %147 : vector<8x1xf32> to vector<8x32xf32>
    %149 = arith.mulf %144, %148 : vector<8x32xf32>
    %150 = vector.broadcast %130 : vector<1x32xf32> to vector<8x32xf32>
    %151 = arith.mulf %149, %150 : vector<8x32xf32>
    %152 = vector.broadcast %131 : vector<1x32xf32> to vector<8x32xf32>
    %153 = arith.addf %151, %152 : vector<8x32xf32>
    %c0_64 = arith.constant 0 : index
    %c0_65 = arith.constant 0 : index
    %c0_66 = arith.constant 0 : index
    %154 = vector.load %arg14[%c0_64, %c0_65, %c0_66] : memref<1x8x32xf32, #tpu.memory_space<vmem>>, vector<1x8x32xf32>
    %155 = vector.shape_cast %154 : vector<1x8x32xf32> to vector<8x32xf32>
    %156 = vector.shape_cast %153 : vector<8x32xf32> to vector<1x8x32xf32>
    tpu.vector_store %arg14[%c0_64, %c0_65, %c0_66], %156 {strides = array<i32>} : memref<1x8x32xf32, #tpu.memory_space<vmem>>, vector<1x8x32xf32>,
    return
  }
  func.func @transform_0(%arg0: i32) -> (i32, i32, i32) {
    %c0_i32 = arith.constant 0 : i32
    %c0_i32_0 = arith.constant 0 : i32
    %c0_i32_1 = arith.constant 0 : i32
    return %arg0, %c0_i32, %c0_i32_0 : i32, i32, i32
  }
  func.func @transform_1(%arg0: i32) -> (i32, i32) {
    %c0_i32 = arith.constant 0 : i32
    %c0_i32_0 = arith.constant 0 : i32
    %c0_i32_1 = arith.constant 0 : i32
    return %c0_i32, %c0_i32_0 : i32, i32
  }
  func.func @transform_2(%arg0: i32) -> (i32, i32) {
    %c0_i32 = arith.constant 0 : i32
    %c0_i32_0 = arith.constant 0 : i32
    %c0_i32_1 = arith.constant 0 : i32
    return %c0_i32, %c0_i32_0 : i32, i32
  }
  func.func @transform_3(%arg0: i32) -> (i32, i32) {
    %c0_i32 = arith.constant 0 : i32
    %c0_i32_0 = arith.constant 0 : i32
    %c0_i32_1 = arith.constant 0 : i32
    return %c0_i32, %c0_i32_0 : i32, i32
  }
  func.func @transform_4(%arg0: i32) -> (i32, i32) {
    %c0_i32 = arith.constant 0 : i32
    %c0_i32_0 = arith.constant 0 : i32
    %c0_i32_1 = arith.constant 0 : i32
    return %c0_i32, %c0_i32_0 : i32, i32
  }
  func.func @transform_5(%arg0: i32) -> (i32, i32) {
    %c0_i32 = arith.constant 0 : i32
    %c0_i32_0 = arith.constant 0 : i32
    %c0_i32_1 = arith.constant 0 : i32
    return %c0_i32, %c0_i32_0 : i32, i32
  }
  func.func @transform_6(%arg0: i32) -> (i32, i32) {
    %c0_i32 = arith.constant 0 : i32
    %c0_i32_0 = arith.constant 0 : i32
    %c0_i32_1 = arith.constant 0 : i32
    return %c0_i32, %c0_i32_0 : i32, i32
  }
  func.func @transform_7(%arg0: i32) -> (i32, i32) {
    %c0_i32 = arith.constant 0 : i32
    %c0_i32_0 = arith.constant 0 : i32
    %c0_i32_1 = arith.constant 0 : i32
    return %c0_i32, %c0_i32_0 : i32, i32
  }
  func.func @transform_8(%arg0: i32) -> (i32, i32) {
    %c0_i32 = arith.constant 0 : i32
    %c0_i32_0 = arith.constant 0 : i32
    %c0_i32_1 = arith.constant 0 : i32
    return %c0_i32, %c0_i32_0 : i32, i32
  }
  func.func @transform_9(%arg0: i32) -> (i32, i32) {
    %c0_i32 = arith.constant 0 : i32
    %c0_i32_0 = arith.constant 0 : i32
    %c0_i32_1 = arith.constant 0 : i32
    return %c0_i32, %c0_i32_0 : i32, i32
  }
  func.func @transform_10(%arg0: i32) -> (i32, i32) {
    %c0_i32 = arith.constant 0 : i32
    %c0_i32_0 = arith.constant 0 : i32
    %c0_i32_1 = arith.constant 0 : i32
    return %c0_i32, %c0_i32_0 : i32, i32
  }
  func.func @transform_11(%arg0: i32) -> (i32, i32) {
    %c0_i32 = arith.constant 0 : i32
    %c0_i32_0 = arith.constant 0 : i32
    %c0_i32_1 = arith.constant 0 : i32
    return %c0_i32, %c0_i32_0 : i32, i32
  }
  func.func @transform_12(%arg0: i32) -> (i32, i32) {
    %c0_i32 = arith.constant 0 : i32
    %c0_i32_0 = arith.constant 0 : i32
    %c0_i32_1 = arith.constant 0 : i32
    return %c0_i32, %c0_i32_0 : i32, i32
  }
  func.func @transform_13(%arg0: i32) -> (i32, i32, i32) {
    %c0_i32 = arith.constant 0 : i32
    %c0_i32_0 = arith.constant 0 : i32
    %c0_i32_1 = arith.constant 0 : i32
    return %arg0, %c0_i32, %c0_i32_0 : i32, i32, i32
  }
}

</mosaic_0001>

<bundles_post_ra>
// kernel: _lambda_.7
= control target key start
LH: loop header
LB: loop body
LE: loop exit
PB: predicated region body
PF: predicated region fallthrough
CT: control target
= control target key end

     0   :  { %s328_s12 = smov 0   ;;  %s357_s0 = inlined_call_operand.vmem [shape: f32[2,8,18], index: 0, kind: input, shape index: {}]   ;;  %s358_s1 = inlined_call_operand.vmem [shape: f32[18,32], index: 1, kind: input, shape index: {}]   ;;  %s359_s2 = inlined_call_operand.vmem [shape: f32[2,1,32], index: 2, kind: input, shape index: {}]   ;;  %s360_s3 = inlined_call_operand.vmem [shape: f32[2,8,32], index: 3, kind: output, shape index: {}]  }
   0x1 LB: > { %s280_s13 = sadd.s32 4294967295, %s306_s12   ;;  %p284_p0 = scmp.ge.s32.totalorder %s306_s12, 1  ;;  %s306_s12 = sphi %s328_s12, %s13_s12  }
   0x2   : > { %p144_p1 = scmp.lt.s32.totalorder %s306_s12, 3 }
   0x4   : > { %p145_p2 = pnand %p284_p0, %p144_p1 }
   0x5   : > { %p169_p3 = scmp.lt.s32.totalorder (!%p145_p2), %s280_s13, 1 }
   0x6   : > { %148 = sbr.rel (%p145_p2) target bundleno = 146 (0x92), region = 32 }
   0xb   : > { %v183_v0 = vld [vmem:[%s358_s1 + $0x10] sm:$0x3]  ;;  %vm192_vm0 = vcmask 1041408   ;;  %v182_v1 = vld [vmem:[%s358_s1 + $0x8] sm:$0xff]  ;;  %v181_v2 = vld [vmem:[%s358_s1] sm:$0xff]  ;;  %s362_s13 = smov (!%p169_p3, %s280_s13), 1 }
   0xc   : > { %287 = vmatpush.msk.msra.mxu0 %vm192_vm0, %v183_v0  ;;  %s285_s20 = sshll.u32 %s362_s13, 3  ;;  %vm188_vm1 = vcmask 146432   ;;  %s175_s23 = scalar_lea.vmem %s359_s2, %s362_s13  ;;  %vm216_vm2 = vcmask 261120  }
   0xd   : > { %s172_s26 = scalar_lea.vmem %s357_s0, %s285_s20  ;;  %v299_v4 = vld [vmem:[%s175_s23] ss:$0 sm:$0xff]  ;;  %s179_s29 = scalar_lea.vmem %s360_s3, %s285_s20 }
   0xe   : > { %210 = vmatpush.msra.mxu0 %v182_v1  ;;  %v180_v3 = vld [vmem:[%s172_s26] sm:$0xff] }
  0x10   : > { %211 = vmatpush.msra.mxu0 %v181_v2 }
  0x11   : > { %288 = vmatmul.msk.f32.vlgmr.msra.gmra.mxu0 %vm188_vm1, %v180_v3 }
  0x8e   : > { %v213_v5 = vpop.f32.mrf.mxu0 }
  0x8f   : > { %v214_v6 = vadd.f32 %v299_v4, %v213_v5 }
  0x91   : > { %217 = vst.msk [vmem:[%s179_s29] sm:$0xff] %vm216_vm2, %v214_v6 }
  0x92 PF: > { %s13_s12 = sadd.s32 1, %s306_s12  }
  0x93   : > { %p10_p4 = scmp.ge.s32.totalorder %s13_s12, 4  }
  0x95   :  { %12 = sbr.rel (!%p10_p4) target bundleno = 1 (0x1), region = 65 }

// kernel: _lambda_.10
= control target key start
LH: loop header
LB: loop body
LE: loop exit
PB: predicated region body
PF: predicated region fallthrough
CT: control target
= control target key end

     0   :  { %s1358_s0 = inlined_call_operand.vmem [shape: f32[2,8,32], index: 0, kind: input, shape index: {}]   ;;  %s1359_s1 = inlined_call_operand.vmem [shape: f32[32,12], index: 1, kind: input, shape index: {}]   ;;  %s1360_s2 = inlined_call_operand.vmem [shape: f32[1,12], index: 2, kind: input, shape index: {}]   ;;  %s1361_s3 = inlined_call_operand.vmem [shape: f32[1,12], index: 3, kind: input, shape index: {}]   ;;  %s1362_s4 = inlined_call_operand.hbm [shape: f32[1,12], index: 4, kind: input, shape index: {}]   ;;  %s1363_s5 = inlined_call_operand.hbm [shape: f32[1,12], index: 5, kind: input, shape index: {}]   ;;  %s1364_s6 = inlined_call_operand.hbm [shape: f32[1,12], index: 6, kind: input, shape index: {}]   ;;  %s1365_s7 = inlined_call_operand.hbm [shape: f32[1,12], index: 7, kind: input, shape index: {}]   ;;  %s1366_s8 = inlined_call_operand.vmem [shape: f32[12,128], index: 8, kind: input, shape index: {}]   ;;  %s1367_s9 = inlined_call_operand.hbm [shape: f32[12,32], index: 9, kind: input, shape index: {}]   ;;  %s1368_s10 = inlined_call_operand.hbm [shape: f32[1,32], index: 10, kind: input, shape index: {}]   ;;  %s1369_s11 = inlined_call_operand.vmem [shape: f32[2,1,32], index: 11, kind: input, shape index: {}]   ;;  %s1370_s12 = inlined_call_operand.vmem [shape: f32[2,8,32], index: 12, kind: output, shape index: {0}]   ;;  %s1371_s13 = inlined_call_operand.vmem [shape: s32[2,8,128], index: 13, kind: output, shape index: {1}]  }
   0x1   :  { %1372 = sst [smem:[#allocation16_spill]] %s1362_s4 }
   0x2   :  { %19 = vsyncpa [#allocation3], 0 }
   0x3   :  { %20 = vsyncpa [#allocation5], 0 }
   0x4   :  { %21 = vsyncpa [#allocation8], 0 }
   0x5   :  { %22 = vsyncpa [#allocation11], 0  ;;  %s1235_s25 = smov 0  }
   0x6 LB: > { %s380_s28 = sshll.u32 %s1363_s5, 4  ;;  %s1244_s29 = sadd.s32 4294967295, %s1155_s25   ;;  %s1155_s25 = sphi %s1235_s25, %s28_s25   ;;  %s381_s28 = int_to_ptr.hbm [resolvable:$true] %s380_s28 }
   0x7   : > { %p836_p0 = scmp.ge.s32.totalorder %s1155_s25, 1  ;;  %p347_p1 = scmp.lt.s32.totalorder %s1155_s25, 3 }
   0x8   : > { %p915_p2 = scmp.eq.s32.totalorder %s1244_s29, 0  ;;  %s1157_s14 = smov [#allocation4]  }
   0x9   : > { %p1249_p3 = pnand %p836_p0, %p347_p1  ;;  %s382_s15 = sshll.u32 %s1157_s14, 4  ;;  %s383_s15 = int_to_ptr.vmem [resolvable:$true] %s382_s15 }
   0xa   : > { %s404_s18 = sshll.u32 %s1365_s7, 4  ;;  %s1374_s4 = sld [smem:[#allocation16_spill]]  ;;  %s405_s18 = int_to_ptr.hbm [resolvable:$true] %s404_s18 }
   0xb   : > { %p896_p4 = pneg %p1249_p3  ;;  %s1158_s23 = smov [#allocation7]  }
   0xc   : > { %s406_s24 = sshll.u32 %s1158_s23, 4  ;;  %s1159_s26 = smov [#allocation2]   ;;  %s407_s24 = int_to_ptr.vmem [resolvable:$true] %s406_s24 }
   0xd   : > { %p1263_p5 = pnand %p915_p2, %p896_p4  ;;  %s370_s27 = sshll.u32 %s1159_s26, 4  ;;  %s371_s27 = int_to_ptr.vmem [resolvable:$true] %s370_s27 }
   0xe   : > { %s392_s17 = sshll.u32 %s1364_s6, 4  ;;  %s418_s23 = sshll.u32 %s1367_s9, 4  ;;  %s393_s17 = int_to_ptr.hbm [resolvable:$true] %s392_s17  ;;  %s419_s23 = int_to_ptr.hbm [resolvable:$true] %s418_s23 }
   0xf   : > { %902 = dma.hbm_to_vmem [thread:$0]  (!%p1263_p5), %s381_s28, 16, %s383_s15, [#allocation5]  }
  0x10   : > { %s368_s21 = sshll.u32 %s1374_s4, 4  ;;  %s1160_s4 = smov [#allocation6]   ;;  %s369_s21 = int_to_ptr.hbm [resolvable:$true] %s368_s21 }
  0x11   : > { %908 = dma.hbm_to_vmem [thread:$0]  (!%p1263_p5), %s405_s18, 16, %s407_s24, [#allocation8]  }
  0x12   : > { %899 = dma.hbm_to_vmem [thread:$0]  (!%p1263_p5), %s369_s21, 16, %s371_s27, [#allocation3]  }
  0x13   : > { %s394_s28 = sshll.u32 %s1160_s4, 4  ;;  %s1161_s15 = smov [#allocation9]   ;;  %s395_s28 = int_to_ptr.vmem [resolvable:$true] %s394_s28 }
  0x14   : > { %905 = dma.hbm_to_vmem [thread:$0]  (!%p1263_p5), %s393_s17, 16, %s395_s28, [#allocation5]  }
  0x15   : > { %s420_s18 = sshll.u32 %s1161_s15, 4  ;;  %s1162_s24 = smov 128   ;;  %s421_s18 = int_to_ptr.vmem [resolvable:$true] %s420_s18 }
  0x16   : > { %s1163_s26 = smov 8   ;;  %s433_s27 = sshll.u32 %s1368_s10, 4  ;;  %s434_s27 = int_to_ptr.hbm [resolvable:$true] %s433_s27 }
  0x17   : > { %911 = dma.hbm_to_vmem [thread:$0]  (!%p1263_p5), %s419_s23, 256, %s421_s18, [#allocation8], %s1162_s24, %s1162_s24, %s1163_s26  }
  0x18   : > { %s1164_s16 = smov [#allocation10]   ;;  %461 = sbr.rel (%p1249_p3) target bundleno = 333 (0x14d), region = 68 }
  0x19   : > { %s435_s19 = sshll.u32 %s1164_s16, 4  ;;  %s436_s19 = int_to_ptr.vmem [resolvable:$true] %s435_s19 }
  0x1a   : > { %914 = dma.hbm_to_vmem [thread:$0]  (!%p1263_p5), %s434_s27, 16, %s436_s19, [#allocation11]  }
  0x1d   : > { %1138 = dma.done.wait (%p915_p2), [#allocation3], 16  }
  0x1e   : > { %1140 = vsyncadd (%p915_p2), [#allocation3], 4294967280 }
  0x1f   : > { %1142 = dma.done.wait (%p915_p2), [#allocation5], 32  }
  0x20   : > { %1144 = vsyncadd (%p915_p2), [#allocation5], 4294967264 }
  0x21   : > { %1146 = dma.done.wait (%p915_p2), [#allocation8], 272  }
  0x22   : > { %1148 = vsyncadd (%p915_p2), [#allocation8], 4294967024 }
  0x23   : > { %1150 = dma.done.wait (%p915_p2), [#allocation11], 16  }
  0x24   : > { %1152 = vsyncadd (%p915_p2), [#allocation11], 4294967280  ;;  %p536_p6 = scmp.lt.s32.totalorder %s1244_s29, 1  ;;  %v555_v0 = vld [vmem:[%s1359_s1 + $0x18] sm:$0xff]  ;;  %v554_v1 = vld [vmem:[%s1359_s1 + $0x10] sm:$0xff]  ;;  %vm560_vm0 = vcmask 261120  }
  0x25   : > { %576 = vmatpush.msra.mxu0 %v555_v0  ;;  %v553_v2 = vld [vmem:[%s1359_s1 + $0x8] sm:$0xff]  ;;  %v552_v3 = vld [vmem:[%s1359_s1] sm:$0xff]  ;;  %vm617_vm1 = vcmask 1043456   ;;  %v644_v6 = vld [vmem:[#allocation9 + $0x8] sm:$0xf]  ;;  %vm613_vm3 = vcmask 97280  }
  0x26   : > { %s1377_s29 = smov (!%p536_p6, %s1244_s29), 1  ;;  %v612_v5 = vld [vmem:[%s1366_s8 + $0x8] sm:$0xf]  ;;  %v611_v7 = vld [vmem:[%s1366_s8] sm:$0xff]  ;;  %857 = vmatpush.msk.msra.mxu2 %vm617_vm1, %v644_v6  ;;  %v949_v32 = vld [vmem:[#allocation10] ss:$0 sm:$0xff] }
  0x27   : > { %s1311_s4 = sshll.u32 %s1377_s29, 3  ;;  %577 = vmatpush.msra.mxu0 %v554_v1  ;;  %855 = vmatpush.msk.msra.mxu1 %vm617_vm1, %v612_v5  ;;  %v643_v8 = vld [vmem:[#allocation9] sm:$0xff]  ;;  %v943_v9 = vld [vmem:[%s1360_s2] ss:$0 sm:$0xff]  ;;  %v946_v15 = vld [vmem:[#allocation4] ss:$0 sm:$0xff]  ;;  %s542_s15 = scalar_lea.vmem %s1369_s11, %s1377_s29 }
  0x28   : > { %s539_s24 = scalar_lea.vmem %s1358_s0, %s1311_s4  ;;  %670 = vmatpush.msra.mxu2 %v643_v8  ;;  %v944_v10 = vld [vmem:[%s1361_s3] ss:$0 sm:$0xff]  ;;  %v947_v24 = vld [vmem:[#allocation7] ss:$0 sm:$0xff]  ;;  %v948_v25 = vld [vmem:[#allocation6] ss:$0 sm:$0xff]  ;;  %s550_s26 = scalar_lea.vmem %s1371_s13, %s1311_s4 }
  0x29   : > { %578 = vmatpush.msra.mxu0 %v553_v2  ;;  %v551_v4 = vld [vmem:[%s539_s24] sm:$0xff]  ;;  %636 = vmatpush.msra.mxu1 %v611_v7  ;;  %s546_s27 = scalar_lea.vmem %s1370_s12, %s1311_s4 }
  0x2a   : > { %v945_v14 = vld [vmem:[#allocation2] ss:$0 sm:$0xff] }
  0x2b   : > { %579 = vmatpush.msra.mxu0 %v552_v3  ;;  %v950_v33 = vld [vmem:[%s542_s15] ss:$0 sm:$0xff] }
  0x2c   : > { %854 = vmatmul.msk.f32.vlgmr.msra.gmra.mxu0 %vm560_vm0, %v551_v4 }
  0xa9   : > { %v581_v11 = vpop.f32.mrf.mxu0 }
  0xaa   : > { %v582_v12 = vadd.f32 %v943_v9, %v581_v11 }
  0xac   : > { %v588_v13 = vadd.f32 %v944_v10, %v582_v12 }
  0xae   : > { %951 = vtanh.f32 %v588_v13 }
  0xb4   : > { %v952_v16 = vpop.eup %951 }
  0xb5   : > { %v594_v17 = vmul.f32 %v952_v16, %v945_v14 }
  0xb7   : > { %v599_v18 = vsub.f32 %v594_v17, %v946_v15 }
  0xb9   : > { %v863_v19 = vcvt.f32.s32 %v599_v18  ;;  %v861_v21 = vand.u32 2147483647, %v599_v18  ;;  %v866_v23 = vand.u32 2147483648, %v599_v18 }
  0xbb   : > { %v864_v20 = vcvt.s32.f32 %v863_v19  ;;  %vm862_vm2 = vcmp.lt.f32.partialorder %v861_v21, 8388608.0 }
  0xbd   : > { %v865_v22 = vand.u32 2147483647, %v864_v20 }
  0xbf   : > { %v867_v26 = vor.u32 %v866_v23, %v865_v22 }
  0xc1   : > { %v868_v27 = vsel %vm862_vm2, %v867_v26, %v599_v18 }
  0xc2   : > { %v610_v28 = vadd.f32 %v947_v24, %v868_v27  ;;  %v605_v29 = vmul.f32 %v948_v25, %v868_v27 }
  0xc4   : > { %856 = vmatmul.msk.f32.vlgmr.msra.gmra.mxu1 %vm613_vm3, %v610_v28  ;;  %858 = vmatmul.msk.f32.vlgmr.msra.gmra.mxu2 %vm613_vm3, %v605_v29 }
 0x141   : > { %v638_v30 = vpop.f32.mrf.mxu1 }
 0x142   : > { %v871_v31 = vcvt.f32.s32 %v638_v30 }
 0x144   : > { %642 = vst [vmem:[%s550_s26] sm:$0xff] %v871_v31 }
 0x147   : > { %v672_v34 = vpop.f32.mrf.mxu2 }
 0x148   : > { %v673_v35 = vadd.f32 %v949_v32, %v672_v34 }
 0x14a   : > { %v679_v36 = vadd.f32 %v950_v33, %v673_v35 }
 0x14c   : > { %680 = vst.msk [vmem:[%s546_s27] sm:$0xff] %vm560_vm0, %v679_v36 }
 0x14d PF: > { %s28_s25 = sadd.s32 1, %s1155_s25  }
 0x14e   : > { %p25_p7 = scmp.ge.s32.totalorder %s28_s25, 4  }
 0x150   :  { %27 = sbr.rel (!%p25_p7) target bundleno = 6 (0x6), region = 138 }
 0x155   :  { %714 = vsyncpa [#allocation3], 1 }
 0x156   :  { %716 = vsyncpa [#allocation3 + $0x1], 1 }
 0x157   :  { %717 = vsyncpa [#allocation5], 1 }
 0x158   :  { %718 = vsyncpa [#allocation8], 1 }
 0x159   :  { %719 = vsyncpa [#allocation11], 1 }

// kernel: _lambda_.8
= control target key start
LH: loop header
LB: loop body
LE: loop exit
PB: predicated region body
PF: predicated region fallthrough
CT: control target
= control target key end

     0   :  { %s1199_s25 = smov 0   ;;  %s1365_s0 = inlined_call_operand.vmem [shape: f32[2,8,32], index: 0, kind: input, shape index: {}]   ;;  %s1366_s1 = inlined_call_operand.vmem [shape: f32[32,96], index: 1, kind: input, shape index: {}]   ;;  %s1367_s2 = inlined_call_operand.vmem [shape: f32[1,96], index: 2, kind: input, shape index: {}]   ;;  %s1368_s3 = inlined_call_operand.vmem [shape: f32[32,32], index: 3, kind: input, shape index: {}]   ;;  %s1369_s4 = inlined_call_operand.vmem [shape: f32[1,32], index: 4, kind: input, shape index: {}]   ;;  %s1370_s5 = inlined_call_operand.vmem [shape: f32[32,64], index: 5, kind: input, shape index: {}]   ;;  %s1371_s6 = inlined_call_operand.vmem [shape: f32[1,64], index: 6, kind: input, shape index: {}]   ;;  %s1372_s7 = inlined_call_operand.vmem [shape: f32[64,32], index: 7, kind: input, shape index: {}]   ;;  %s1373_s8 = inlined_call_operand.vmem [shape: f32[1,32], index: 8, kind: input, shape index: {}]   ;;  %s1374_s9 = inlined_call_operand.vmem [shape: f32[1,32], index: 9, kind: input, shape index: {}]   ;;  %s1375_s10 = inlined_call_operand.vmem [shape: f32[1,32], index: 10, kind: input, shape index: {}]   ;;  %s1376_s11 = inlined_call_operand.vmem [shape: f32[1,32], index: 11, kind: input, shape index: {}]   ;;  %s1377_s12 = inlined_call_operand.vmem [shape: f32[1,32], index: 12, kind: input, shape index: {}]   ;;  %s1378_s13 = inlined_call_operand.vmem [shape: f32[2,8,32], index: 13, kind: output, shape index: {}]  }
   0x1 LB: > { %s1031_s26 = sadd.s32 4294967295, %s1115_s25   ;;  %p1035_p0 = scmp.ge.s32.totalorder %s1115_s25, 1  ;;  %s1115_s25 = sphi %s1199_s25, %s23_s25  }
   0x2   : > { %p386_p1 = scmp.lt.s32.totalorder %s1115_s25, 3 }
   0x4   : > { %p387_p2 = pnand %p1035_p0, %p386_p1 }
   0x5   : > { %p428_p3 = scmp.lt.s32.totalorder (!%p387_p2), %s1031_s26, 1  ;;  %s1117_s24 = smov (!%p387_p2), 88  }
   0x6   : > { %390 = sbr.rel (%p387_p2) target bundleno = 2258 (0x8d2), region = 72  ;;  %s1118_s27 = smov (!%p387_p2), 96  }
   0x7   : > { %s1119_s28 = smov (!%p387_p2), 120   ;;  %s1120_s29 = smov (!%p387_p2), 72  }
   0x8   : > { %s1121_s30 = smov (!%p387_p2), 104   ;;  %s1122_s14 = smov (!%p387_p2), 80  }
   0x9   : > { %s1123_s17 = smov (!%p387_p2), 64   ;;  %s1124_s19 = smov (!%p387_p2), 112  }
   0xa   : > { %s1125_s20 = smov (!%p387_p2), 48   ;;  %s1127_s22 = smov (!%p387_p2), 40  }
   0xb   : > { %v440_v0 = vld [vmem:[%s1366_s1 + $0x18] sm:$0xff]  ;;  %v439_v1 = vld [vmem:[%s1366_s1 + $0x10] sm:$0xff]  ;;  %v438_v2 = vld [vmem:[%s1366_s1 + $0x8] sm:$0xff]  ;;  %s1380_s26 = smov (!%p428_p3, %s1031_s26), 1  ;;  %vm445_vm0 = vcmask 261120   ;;  %vm476_vm1 = vcmask 64512  }
   0xc   : > { %461 = vmatpush.msra.mxu0 %v440_v0  ;;  %v437_v3 = vld [vmem:[%s1366_s1] sm:$0xff]  ;;  %s1036_s18 = sshll.u32 %s1380_s26, 3  ;;  %vm920_vm6 = vcmask 523264  }
   0xd   : > { %s431_s21 = scalar_lea.vmem %s1365_s0, %s1036_s18  ;;  %v1079_v5 = vld [vmem:[%s1367_s2] ss:$0 sm:$0xff] }
   0xe   : > { %462 = vmatpush.msra.mxu0 %v439_v1  ;;  %v1227_v4 = vld [vmem:[%s431_s21] sm:$0xff]  ;;  %s1126_s21 = smov 56  }
   0xf   : > { %v469_v8 = vld [vmem:[%s1368_s3] sm:$0xff] }
  0x10   : > { %463 = vmatpush.msra.mxu0 %v438_v2  ;;  %646 = vmatpush.msra.mxu3 %v469_v8  ;;  %v470_v2 = vld [vmem:[%s1368_s3 + $0x8] sm:$0xff] }
  0x12   : > { %464 = vmatpush.msra.mxu0 %v437_v3  ;;  %v471_v3 = vld [vmem:[%s1368_s3 + $0x10] sm:$0xff] }
  0x13   : > { %1038 = vmatmul.msk.f32.vlgmr.msra.gmra.mxu0 %vm445_vm0, %v1227_v4 }
  0x90   : > { %v466_v6 = vpop.f32.mrf.mxu0 }
  0x91   : > { %v1234_v7 = vadd.f32 %v1079_v5, %v466_v6 }
  0x93   : > { %541 = vrot.lane.b32.xlu2 %v1234_v7, %s1117_s24  ;;  %474 = vrot.lane.b32.xlu0 %v1234_v7, %s1118_s27 }
  0x9b   : > { %539 = vrot.lane.b32.xlu2 %v1234_v7, %s1119_s28 }
  0xa3   : > { %743 = vrot.lane.b32.xlu2 %v1234_v7, %s1120_s29  ;;  %s435_s29 = scalar_lea.vmem %s1378_s13, %s1036_s18 }
  0xab   : > { %741 = vrot.lane.b32.xlu2 %v1234_v7, %s1121_s30 }
  0xb3   : > { %653 = vrot.lane.b32.xlu2 %v1234_v7, %s1122_s14 }
  0xed   : > { %v542_v9 = vpop.permute.xlu2 %541 }
  0xee   : > { %1042 = vmatpush.xpose.msk.msrb.mxu0 %vm476_vm1, %v542_v9 }
  0xf5   : > { %v540_v10 = vpop.permute.xlu2 %539 }
  0xf6   : > { %1043 = vmatmul.msk.f32.vlgmr.msrb.gmra.mxu0 %vm476_vm1, %v540_v10 }
  0xfd   : > { %v744_v11 = vpop.permute.xlu2 %743 }
  0xfe   : > { %1051 = vmatpush.xpose.msk.msrb.mxu3 %vm476_vm1, %v744_v11 }
 0x105   : > { %v742_v12 = vpop.permute.xlu2 %741  ;;  %v475_v13 = vpop.permute.xlu0 %474 }
 0x106   : > { %1039 = vmatpush.xpose.msk.msra.mxu1 %vm476_vm1, %v475_v13  ;;  %v1080_v13 = vld [vmem:[%s1369_s4] ss:$0 sm:$0xff] }
 0x109   : > { %1040 = vmatmul.msk.f32.vlgmr.msra.gmra.mxu1 %vm476_vm1, %v1234_v7 }
 0x10a   : > { %623 = vmatpush.msrb.mxu1 %v470_v2 }
 0x10c   : > { %735 = vmatpush.msra.mxu1 %v471_v3 }
 0x10d   : > { %v654_v14 = vpop.permute.xlu2 %653 }
 0x10e   : > { %1047 = vmatpush.xpose.msk.msra.mxu0 %vm476_vm1, %v654_v14 }
 0x173   : > { %v564_v15 = vpop.f32.mrf.mxu0 }
 0x174   : > { %v567_v16 = vmul.f32 0.35355338, %v564_v15 }
 0x176   : > { %v568_v17 = vsel %vm476_vm1, %v567_v16, -inf }
 0x177   : > { %569 = vmax.xlane.f32.xlu2 %v568_v17 }
 0x186   : > { %v498_v18 = vpop.f32.mrf.mxu1 }
 0x187   : > { %v501_v19 = vmul.f32 0.35355338, %v498_v18 }
 0x189   : > { %v502_v20 = vsel %vm476_vm1, %v501_v19, -inf }
 0x18a   : > { %503 = vmax.xlane.f32.xlu0 %v502_v20 }
 0x1ea   : > { %v570_v35 = vpop.xlane.xlu2 %569 }
 0x1eb   : > { %v571_v37 = vsub.f32 %v567_v16, %v570_v35  ;;  %v914_v35 = vld [vmem:[%s1372_s7 + $0x30] sm:$0xff] }
 0x1ed   : > { %v572_v38 = vmul.f32 1.442695, %v571_v37 }
 0x1fd   : > { %v504_v21 = vpop.xlane.xlu0 %503 }
 0x1fe   : > { %v505_v22 = vsub.f32 %v501_v19, %v504_v21  ;;  %v1128_v19 = vmov 32.0  }
 0x200   : > { %v506_v23 = vmul.f32 1.442695, %v505_v22 }
 0x202   : > { %1087 = vpow2.f32 %v506_v23 }
 0x208   : > { %v1088_v24 = vpop.eup %1087 }
 0x209   : > { %v508_v25 = vsel %vm476_vm1, %v1088_v24, 0.0 }
 0x20a   : > { %509 = vadd.xlane.f32.xlu1 %v508_v25 }
 0x223   : > { %513 = vrot.lane.b32.xlu1 %v1234_v7, %s1123_s17 }
 0x22b   : > { %651 = vrot.lane.b32.xlu1 %v1234_v7, %s1124_s19 }
 0x27d   : > { %v510_v26 = vpop.xlane.xlu1 %509 }
 0x27e   : > { %1089 = vrcp.f32 %v510_v26 }
 0x27f   : > { %1091 = vpow2.f32 %v572_v38 }
 0x284   : > { %v1090_v27 = vpop.eup %1089 }
 0x285   : > { %v512_v29 = vmul.f32 %v1090_v27, %v1088_v24  ;;  %v1092_v45 = vpop.eup %1091 }
 0x286   : > { %v574_v46 = vsel %vm476_vm1, %v1092_v45, 0.0 }
 0x295   : > { %v514_v28 = vpop.permute.xlu1 %513 }
 0x296   : > { %534 = vmatpush.msra.mxu2 %v514_v28 }
 0x297   : > { %1041 = vmatmul.msk.f32.vlgmr.msra.gmra.mxu2 %vm476_vm1, %v512_v29 }
 0x29d   : > { %v652_v30 = vpop.permute.xlu1 %651 }
 0x29e   : > { %1048 = vmatmul.msk.f32.vlgmr.msra.gmra.mxu0 %vm476_vm1, %v652_v30  ;;  %v879_v30 = vld [vmem:[%s1370_s5 + $0x18] sm:$0xff] }
 0x31a   : > { %v536_v31 = vpop.f32.mrf.mxu2 }
 0x31b   : > { %1046 = vmatmul.msk.f32.vlgmr.msra.gmra.mxu3 %vm476_vm1, %v536_v31  ;;  %v676_v32 = vpop.f32.mrf.mxu0  ;;  %v878_v31 = vld [vmem:[%s1370_s5 + $0x10] sm:$0xff] }
 0x31c   : > { %v679_v33 = vmul.f32 0.35355338, %v676_v32  ;;  %v877_v32 = vld [vmem:[%s1370_s5 + $0x8] sm:$0xff] }
 0x31e   : > { %v680_v34 = vsel %vm476_vm1, %v679_v33, -inf }
 0x31f   : > { %681 = vmax.xlane.f32.xlu1 %v680_v34  ;;  %v915_v34 = vld [vmem:[%s1372_s7 + $0x38] sm:$0xff] }
 0x320   : > { %932 = vmatpush.msra.mxu3 %v915_v34 }
 0x322   : > { %933 = vmatpush.msra.mxu3 %v914_v35 }
 0x323   : > { %1052 = vmatmul.msk.f32.vlgmr.msrb.gmra.mxu3 %vm476_vm1, %v742_v12 }
 0x338   : > { %691 = vrot.lane.b32.xlu1 %v1234_v7, %s1125_s20 }
 0x392   : > { %v682_v39 = vpop.xlane.xlu1 %681 }
 0x393   : > { %v683_v42 = vsub.f32 %v679_v33, %v682_v39  ;;  %v876_v33 = vld [vmem:[%s1370_s5] sm:$0xff] }
 0x394   : > { %v912_v39 = vld [vmem:[%s1372_s7 + $0x20] sm:$0xff] }
 0x395   : > { %v684_v44 = vmul.f32 1.442695, %v683_v42 }
 0x397   : > { %1093 = vpow2.f32 %v684_v44 }
 0x39d   : > { %v1094_v47 = vpop.eup %1093 }
 0x39e   : > { %v1263_v36 = vpop.f32.mrf.mxu3  ;;  %v686_v48 = vsel %vm476_vm1, %v1094_v47, 0.0 }
 0x3a6   : > { %v766_v40 = vpop.f32.mrf.mxu3 }
 0x3a7   : > { %v769_v41 = vmul.f32 0.35355338, %v766_v40 }
 0x3a9   : > { %v770_v43 = vsel %vm476_vm1, %v769_v41, -inf }
 0x3aa   : > { %771 = vmax.xlane.f32.xlu0 %v770_v43  ;;  %v692_v59 = vpop.permute.xlu1 %691 }
 0x3b2   : > { %575 = vadd.xlane.f32.xlu0 %v574_v46 }
 0x3ba   : > { %687 = vadd.xlane.f32.xlu0 %v686_v48  ;;  %v1081_v48 = vld [vmem:[%s1374_s9] ss:$0 sm:$0xff] }
 0x3ce   : > { %579 = vrot.lane.b32.xlu0 %v1234_v7, %s1126_s21 }
 0x41d   : > { %v772_v49 = vpop.xlane.xlu0 %771 }
 0x41e   : > { %v773_v50 = vsub.f32 %v769_v41, %v772_v49  ;;  %v911_v41 = vld [vmem:[%s1372_s7 + $0x18] sm:$0xff] }
 0x420   : > { %v774_v51 = vmul.f32 1.442695, %v773_v50 }
 0x422   : > { %1095 = vpow2.f32 %v774_v51  ;;  %v1082_v51 = vld [vmem:[%s1375_s10] ss:$0 sm:$0xff] }
 0x425   : > { %v576_v54 = vpop.xlane.xlu0 %575 }
 0x426   : > { %1097 = vrcp.f32 %v576_v54  ;;  %v910_v54 = vld [vmem:[%s1372_s7 + $0x10] sm:$0xff] }
 0x428   : > { %v1096_v52 = vpop.eup %1095 }
 0x429   : > { %v776_v53 = vsel %vm476_vm1, %v1096_v52, 0.0 }
 0x42a   : > { %777 = vadd.xlane.f32.xlu2 %v776_v53 }
 0x42c   : > { %v1098_v56 = vpop.eup %1097 }
 0x42d   : > { %v688_v55 = vpop.xlane.xlu0 %687  ;;  %v578_v58 = vmul.f32 %v1098_v56, %v1092_v45  ;;  %v908_v56 = vld [vmem:[%s1372_s7] sm:$0xff] }
 0x42e   : > { %1099 = vrcp.f32 %v688_v55  ;;  %v909_v55 = vld [vmem:[%s1372_s7 + $0x8] sm:$0xff] }
 0x434   : > { %v1100_v60 = vpop.eup %1099 }
 0x435   : > { %v690_v61 = vmul.f32 %v1100_v60, %v1094_v47 }
 0x440   : > { %v580_v57 = vpop.permute.xlu0 %579 }
 0x441   : > { %600 = vmatpush.msrb.mxu2 %v580_v57  ;;  %v1083_v57 = vld [vmem:[%s1371_s6] ss:$0 sm:$0xff] }
 0x442   : > { %781 = vrot.lane.b32.xlu2 %v1234_v7, %s1127_s22  ;;  %1044 = vmatmul.msk.f32.vlgmr.msrb.gmra.mxu2 %vm476_vm1, %v578_v58  ;;  %v472_v7 = vld [vmem:[%s1368_s3 + $0x18] sm:$0xff] }
 0x443   : > { %712 = vmatpush.msra.mxu2 %v692_v59 }
 0x445   : > { %825 = vmatpush.msrb.mxu2 %v472_v7 }
 0x44a   : > { %1049 = vmatmul.msk.f32.vlgmr.msra.gmra.mxu2 %vm476_vm1, %v690_v61  ;;  %v1084_v61 = vld [vmem:[%s1373_s8] ss:$0 sm:$0xff] }
 0x49d   : > { %v778_v62 = vpop.xlane.xlu2 %777 }
 0x49e   : > { %1101 = vrcp.f32 %v778_v62 }
 0x49f   : > { %1103 = vrcp.f32 %v1128_v19  ;;  %v1086_v19 = vld [vmem:[%s1377_s12] ss:$0 sm:$0xff] }
 0x4a4   : > { %v1102_v63 = vpop.eup %1101 }
 0x4a5   : > { %v780_v0 = vmul.f32 %v1102_v63, %v1096_v52  ;;  %v782_v1 = vpop.permute.xlu2 %781  ;;  %v1104_v20 = vpop.eup %1103 }
 0x4a6   : > { %802 = vmatpush.msrb.mxu0 %v782_v1  ;;  %v843_v21 = vmul.f32 32.0, %v1104_v20  ;;  %vm847_vm2 = vweird.f32 %v1104_v20 }
 0x4a7   : > { %1053 = vmatmul.msk.f32.vlgmr.msrb.gmra.mxu0 %vm476_vm1, %v780_v0 }
 0x4a8   : > { %v844_v22 = vsub.f32 1.0, %v843_v21 }
 0x4aa   : > { %v845_v23 = vmul.f32 %v1104_v20, %v844_v22 }
 0x4ac   : > { %v846_v24 = vadd.f32 %v1104_v20, %v845_v23 }
 0x4ae   : > { %v1292_v25 = vsel %vm847_vm2, %v1104_v20, %v846_v24 }
 0x4c5   : > { %v602_v5 = vpop.f32.mrf.mxu2 }
 0x4c6   : > { %1045 = vmatmul.msk.f32.vlgmr.msrb.gmra.mxu1 %vm476_vm1, %v602_v5 }
 0x4c7   : > { %899 = vmatpush.msrb.mxu1 %v879_v30 }
 0x4c9   : > { %900 = vmatpush.msrb.mxu1 %v878_v31 }
 0x4cb   : > { %901 = vmatpush.msrb.mxu1 %v877_v32 }
 0x4cd   : > { %v714_v6 = vpop.f32.mrf.mxu2  ;;  %902 = vmatpush.msrb.mxu1 %v876_v33 }
 0x4ce   : > { %1050 = vmatmul.msk.f32.vlgmr.msra.gmra.mxu1 %vm476_vm1, %v714_v6 }
 0x524   : > { %v804_v8 = vpop.f32.mrf.mxu0 }
 0x525   : > { %1054 = vmatmul.msk.f32.vlgmr.msrb.gmra.mxu2 %vm476_vm1, %v804_v8 }
 0x543   : > { %v625_v9 = vpop.f32.mrf.mxu1 }
 0x544   : > { %v649_v11 = vadd.f32 %v1263_v36, %v625_v9  ;;  %v913_v36 = vld [vmem:[%s1372_s7 + $0x28] sm:$0xff] }
 0x545   : > { %934 = vmatpush.msra.mxu3 %v913_v36 }
 0x547   : > { %935 = vmatpush.msra.mxu3 %v912_v39 }
 0x549   : > { %936 = vmatpush.msra.mxu3 %v911_v41 }
 0x54b   : > { %v737_v10 = vpop.f32.mrf.mxu1  ;;  %937 = vmatpush.msra.mxu3 %v910_v54 }
 0x54c   : > { %v740_v12 = vadd.f32 %v737_v10, %v649_v11 }
 0x54d   : > { %938 = vmatpush.msra.mxu3 %v909_v55 }
 0x54f   : > { %939 = vmatpush.msra.mxu3 %v908_v56 }
 0x5a8   : > { %v827_v14 = vpop.f32.mrf.mxu2 }
 0x5a9   : > { %v830_v15 = vadd.f32 %v827_v14, %v740_v12 }
 0x5ab   : > { %v835_v16 = vadd.f32 %v1080_v13, %v830_v15 }
 0x5ad   : > { %v836_v17 = vadd.f32 %v835_v16, %v1227_v4 }
 0x5af   : > { %v839_v18 = vsel %vm445_vm0, %v836_v17, 0.0 }
 0x5b0   : > { %840 = vadd.xlane.f32.xlu0 %v839_v18 }
 0x623   : > { %v841_v26 = vpop.xlane.xlu0 %840 }
 0x624   : > { %v849_v27 = vmul.f32 %v1292_v25, %v841_v26 }
 0x626   : > { %v850_v28 = vsub.f32 %v836_v17, %v849_v27  ;;  %v1085_v17 = vld [vmem:[%s1376_s11] ss:$0 sm:$0xff] }
 0x628   : > { %v851_v29 = vmul.f32 %v850_v28, %v850_v28 }
 0x62a   : > { %v852_v4 = vsel %vm445_vm0, %v851_v29, 0.0 }
 0x62b   : > { %853 = vadd.xlane.f32.xlu1 %v852_v4 }
 0x69e   : > { %v854_v37 = vpop.xlane.xlu1 %853 }
 0x69f   : > { %v855_v38 = vmul.f32 %v854_v37, %v1292_v25 }
 0x6a1   : > { %v856_v40 = vadd.f32 1e-05, %v855_v38 }
 0x6a3   : > { %1105 = vrsqrt.f32 %v856_v40  ;;  %vm863_vm4 = vweird.f32 %v856_v40 }
 0x6a9   : > { %v1106_v42 = vpop.eup %1105 }
 0x6aa   : > { %v858_v43 = vmul.f32 %v1106_v42, %v856_v40  ;;  %vm864_vm3 = vweird.f32 %v1106_v42 }
 0x6ab   : > { %vm865_vm5 = vmor %vm863_vm4, %vm864_vm3 }
 0x6ac   : > { %v859_v44 = vmul.f32 %v1106_v42, %v858_v43 }
 0x6ae   : > { %v860_v45 = vmul.f32 0.5, %v859_v44 }
 0x6b0   : > { %v861_v46 = vsub.f32 1.5, %v860_v45 }
 0x6b2   : > { %v862_v47 = vmul.f32 %v1106_v42, %v861_v46 }
 0x6b4   : > { %v866_v49 = vsel %vm865_vm5, %v1106_v42, %v862_v47 }
 0x6b5   : > { %v867_v50 = vmul.f32 %v866_v49, %v850_v28 }
 0x6b7   : > { %v871_v52 = vmul.f32 %v1081_v48, %v867_v50 }
 0x6b9   : > { %v875_v53 = vadd.f32 %v1082_v51, %v871_v52 }
 0x6bb   : > { %1055 = vmatmul.msk.f32.vlgmr.msrb.gmra.mxu1 %vm445_vm0, %v875_v53 }
 0x738   : > { %v904_v58 = vpop.f32.mrf.mxu1 }
 0x739   : > { %v905_v59 = vadd.f32 %v1083_v57, %v904_v58 }
 0x73b   : > { %v907_v60 = vmax.f32 %v905_v59, 0.0 }
 0x73d   : > { %1056 = vmatmul.msk.f32.vlgmr.msra.gmra.mxu3 %vm920_vm6, %v907_v60 }
 0x7c0   : > { %v941_v62 = vpop.f32.mrf.mxu3 }
 0x7c1   : > { %v942_v63 = vadd.f32 %v1084_v61, %v941_v62 }
 0x7c3   : > { %v944_v0 = vadd.f32 %v942_v63, %v875_v53 }
 0x7c5   : > { %v947_v1 = vsel %vm445_vm0, %v944_v0, 0.0 }
 0x7c6   : > { %948 = vadd.xlane.f32.xlu2 %v947_v1 }
 0x839   : > { %v949_v2 = vpop.xlane.xlu2 %948 }
 0x83a   : > { %v950_v3 = vmul.f32 %v949_v2, %v1292_v25 }
 0x83c   : > { %v951_v5 = vsub.f32 %v944_v0, %v950_v3 }
 0x83e   : > { %v952_v6 = vmul.f32 %v951_v5, %v951_v5 }
 0x840   : > { %v953_v7 = vsel %vm445_vm0, %v952_v6, 0.0 }
 0x841   : > { %954 = vadd.xlane.f32.xlu0 %v953_v7 }
 0x8b4   : > { %v955_v8 = vpop.xlane.xlu0 %954 }
 0x8b5   : > { %v956_v9 = vmul.f32 %v955_v8, %v1292_v25 }
 0x8b7   : > { %v957_v10 = vadd.f32 1e-05, %v956_v9 }
 0x8b9   : > { %1107 = vrsqrt.f32 %v957_v10  ;;  %vm964_vm8 = vweird.f32 %v957_v10 }
 0x8bf   : > { %v1108_v11 = vpop.eup %1107 }
 0x8c0   : > { %v959_v12 = vmul.f32 %v1108_v11, %v957_v10  ;;  %vm965_vm7 = vweird.f32 %v1108_v11 }
 0x8c1   : > { %vm966_vm9 = vmor %vm964_vm8, %vm965_vm7 }
 0x8c2   : > { %v960_v13 = vmul.f32 %v1108_v11, %v959_v12 }
 0x8c4   : > { %v961_v14 = vmul.f32 0.5, %v960_v13 }
 0x8c6   : > { %v962_v15 = vsub.f32 1.5, %v961_v14 }
 0x8c8   : > { %v963_v16 = vmul.f32 %v1108_v11, %v962_v15 }
 0x8ca   : > { %v967_v18 = vsel %vm966_vm9, %v1108_v11, %v963_v16 }
 0x8cb   : > { %v968_v20 = vmul.f32 %v967_v18, %v951_v5 }
 0x8cd   : > { %v972_v21 = vmul.f32 %v1085_v17, %v968_v20 }
 0x8cf   : > { %v976_v22 = vadd.f32 %v1086_v19, %v972_v21 }
 0x8d1   : > { %977 = vst.msk [vmem:[%s435_s29] sm:$0xff] %vm445_vm0, %v976_v22 }
 0x8d2 PF: > { %s23_s25 = sadd.s32 1, %s1115_s25  }
 0x8d3   : > { %p20_p4 = scmp.ge.s32.totalorder %s23_s25, 4  }
 0x8d5   :  { %22 = sbr.rel (!%p20_p4) target bundleno = 1 (0x1), region = 102 }

// kernel: _lambda_.13
= control target key start
LH: loop header
LB: loop body
LE: loop exit
PB: predicated region body
PF: predicated region fallthrough
CT: control target
= control target key end

     0   :  { %s300_s12 = smov 0   ;;  %s332_s0 = inlined_call_operand.vmem [shape: f32[2,8,32], index: 0, kind: input, shape index: {}]   ;;  %s333_s1 = inlined_call_operand.vmem [shape: f32[32,128], index: 1, kind: input, shape index: {}]   ;;  %s334_s2 = inlined_call_operand.vmem [shape: f32[1,128], index: 2, kind: input, shape index: {}]   ;;  %s335_s3 = inlined_call_operand.vmem [shape: f32[2,8,128], index: 3, kind: output, shape index: {}]  }
   0x1 LB: > { %s253_s13 = sadd.s32 4294967295, %s278_s12   ;;  %p257_p0 = scmp.ge.s32.totalorder %s278_s12, 1  ;;  %s278_s12 = sphi %s300_s12, %s13_s12  }
   0x2   : > { %p136_p1 = scmp.lt.s32.totalorder %s278_s12, 3 }
   0x4   : > { %p137_p2 = pnand %p257_p0, %p136_p1 }
   0x5   : > { %p158_p3 = scmp.lt.s32.totalorder (!%p137_p2), %s253_s13, 1 }
   0x6   : > { %140 = sbr.rel (%p137_p2) target bundleno = 148 (0x94), region = 32 }
   0xb   : > { %v170_v0 = vld [vmem:[%s333_s1 + $0x18] sm:$0xff]  ;;  %v169_v1 = vld [vmem:[%s333_s1 + $0x10] sm:$0xff]  ;;  %v168_v2 = vld [vmem:[%s333_s1 + $0x8] sm:$0xff]  ;;  %s337_s13 = smov (!%p158_p3, %s253_s13), 1  ;;  %vm175_vm0 = vcmask 261120  }
   0xc   : > { %191 = vmatpush.msra.mxu0 %v170_v0  ;;  %v167_v3 = vld [vmem:[%s333_s1] sm:$0xff]  ;;  %s258_s22 = sshll.u32 %s337_s13, 3 }
   0xd   : > { %s161_s25 = scalar_lea.vmem %s332_s0, %s258_s22  ;;  %v271_v5 = vld [vmem:[%s334_s2] ss:$0 sm:$0xff]  ;;  %s165_s30 = scalar_lea.vmem %s335_s3, %s258_s22 }
   0xe   : > { %192 = vmatpush.msra.mxu0 %v169_v1  ;;  %v166_v4 = vld [vmem:[%s161_s25] sm:$0xff] }
  0x10   : > { %193 = vmatpush.msra.mxu0 %v168_v2 }
  0x12   : > { %194 = vmatpush.msra.mxu0 %v167_v3 }
  0x13   : > { %260 = vmatmul.msk.f32.vlgmr.msra.gmra.mxu0 %vm175_vm0, %v166_v4 }
  0x90   : > { %v196_v6 = vpop.f32.mrf.mxu0 }
  0x91   : > { %v197_v7 = vadd.f32 %v271_v5, %v196_v6 }
  0x93   : > { %199 = vst [vmem:[%s165_s30] sm:$0xff] %v197_v7 }
  0x94 PF: > { %s13_s12 = sadd.s32 1, %s278_s12  }
  0x95   : > { %p10_p4 = scmp.ge.s32.totalorder %s13_s12, 4  }
  0x97   :  { %12 = sbr.rel (!%p10_p4) target bundleno = 1 (0x1), region = 62 }

// kernel: _lambda_.11
= control target key start
LH: loop header
LB: loop body
LE: loop exit
PB: predicated region body
PF: predicated region fallthrough
CT: control target
= control target key end

     0   :  { %s1981_s0 = inlined_call_operand.vmem [shape: f32[2,8,32], index: 0, kind: input, shape index: {}]   ;;  %s1982_s1 = inlined_call_operand.vmem [shape: f32[32,96], index: 1, kind: input, shape index: {}]   ;;  %s1983_s2 = inlined_call_operand.hbm [shape: f32[1,96], index: 2, kind: input, shape index: {}]   ;;  %s1984_s3 = inlined_call_operand.vmem [shape: f32[32,32], index: 3, kind: input, shape index: {}]   ;;  %s1985_s4 = inlined_call_operand.hbm [shape: f32[1,32], index: 4, kind: input, shape index: {}]   ;;  %s1986_s5 = inlined_call_operand.vmem [shape: f32[32,64], index: 5, kind: input, shape index: {}]   ;;  %s1987_s6 = inlined_call_operand.hbm [shape: f32[1,64], index: 6, kind: input, shape index: {}]   ;;  %s1988_s7 = inlined_call_operand.vmem [shape: f32[64,32], index: 7, kind: input, shape index: {}]   ;;  %s1989_s8 = inlined_call_operand.hbm [shape: f32[1,32], index: 8, kind: input, shape index: {}]   ;;  %s1990_s9 = inlined_call_operand.hbm [shape: f32[1,32], index: 9, kind: input, shape index: {}]   ;;  %s1991_s10 = inlined_call_operand.hbm [shape: f32[1,32], index: 10, kind: input, shape index: {}]   ;;  %s1992_s11 = inlined_call_operand.hbm [shape: f32[1,32], index: 11, kind: input, shape index: {}]   ;;  %s1993_s12 = inlined_call_operand.hbm [shape: f32[1,32], index: 12, kind: input, shape index: {}]   ;;  %s1994_s13 = inlined_call_operand.vmem [shape: f32[2,8,32], index: 13, kind: output, shape index: {}]  }
   0x1   :  { %1995 = sst [smem:[#allocation20_spill]] %s1985_s4 }
   0x2   :  { %18 = vsyncpa [#allocation3], 0 }
   0x3   :  { %19 = vsyncpa [#allocation5], 0 }
   0x4   :  { %20 = vsyncpa [#allocation8], 0 }
   0x5   :  { %21 = vsyncpa [#allocation11], 0 }
   0x6   :  { %22 = vsyncpa [#allocation14], 0  ;;  %s1760_s25 = smov 0  }
   0x7 LB: > { %s1996_s4 = sld [smem:[#allocation20_spill]]  ;;  %s1769_s29 = sadd.s32 4294967295, %s1668_s25   ;;  %s1668_s25 = sphi %s1760_s25, %s28_s25  }
   0x8   : > { %p1229_p0 = scmp.ge.s32.totalorder %s1668_s25, 1  ;;  %p337_p1 = scmp.lt.s32.totalorder %s1668_s25, 3 }
   0x9   : > { %p1328_p2 = scmp.eq.s32.totalorder %s1769_s29, 0  ;;  %s1670_s14 = smov [#allocation4]  }
   0xa   : > { %p1774_p3 = pnand %p1229_p0, %p337_p1  ;;  %s369_s15 = sshll.u32 %s1670_s14, 4  ;;  %s370_s15 = int_to_ptr.vmem [resolvable:$true] %s369_s15 }
   0xb   : > { %s397_s18 = sshll.u32 %s1989_s8, 4  ;;  %s421_s21 = sshll.u32 %s1991_s10, 4  ;;  %s398_s18 = int_to_ptr.hbm [resolvable:$true] %s397_s18  ;;  %s422_s21 = int_to_ptr.hbm [resolvable:$true] %s421_s21 }
   0xc   : > { %p1303_p4 = pneg %p1774_p3  ;;  %s1671_s23 = smov [#allocation7]  }
   0xd   : > { %s367_s28 = sshll.u32 %s1996_s4, 4  ;;  %s399_s24 = sshll.u32 %s1671_s23, 4  ;;  %s368_s28 = int_to_ptr.hbm [resolvable:$true] %s367_s28  ;;  %s400_s24 = int_to_ptr.vmem [resolvable:$true] %s399_s24 }
   0xe   : > { %p1788_p5 = pnand %p1328_p2, %p1303_p4  ;;  %s1672_s26 = smov [#allocation10]  }
   0xf   : > { %s423_s27 = sshll.u32 %s1672_s26, 4  ;;  %s352_s17 = sshll.u32 %s1983_s2, 4  ;;  %s424_s27 = int_to_ptr.vmem [resolvable:$true] %s423_s27  ;;  %s353_s17 = int_to_ptr.hbm [resolvable:$true] %s352_s17 }
  0x10   : > { %1309 = dma.hbm_to_vmem [thread:$0]  (!%p1788_p5), %s368_s28, 16, %s370_s15, [#allocation5]  }
  0x11   : > { %1315 = dma.hbm_to_vmem [thread:$0]  (!%p1788_p5), %s398_s18, 16, %s400_s24, [#allocation8]  }
  0x12   : > { %1321 = dma.hbm_to_vmem [thread:$0]  (!%p1788_p5), %s422_s21, 16, %s424_s27, [#allocation11]  }
  0x13   : > { %s382_s23 = sshll.u32 %s1987_s6, 4  ;;  %s1673_s4 = smov [#allocation2]   ;;  %s383_s23 = int_to_ptr.hbm [resolvable:$true] %s382_s23 }
  0x14   : > { %s354_s28 = sshll.u32 %s1673_s4, 4  ;;  %s1674_s15 = smov [#allocation6]   ;;  %s355_s28 = int_to_ptr.vmem [resolvable:$true] %s354_s28 }
  0x15   : > { %1306 = dma.hbm_to_vmem [thread:$0]  (!%p1788_p5), %s353_s17, 16, %s355_s28, [#allocation3]  }
  0x16   : > { %s384_s18 = sshll.u32 %s1674_s15, 4  ;;  %s409_s14 = sshll.u32 %s1990_s9, 4  ;;  %s385_s18 = int_to_ptr.vmem [resolvable:$true] %s384_s18  ;;  %s410_s14 = int_to_ptr.hbm [resolvable:$true] %s409_s14 }
  0x17   : > { %1312 = dma.hbm_to_vmem [thread:$0]  (!%p1788_p5), %s383_s23, 16, %s385_s18, [#allocation5]  }
  0x18   : > { %s433_s4 = sshll.u32 %s1992_s11, 4  ;;  %s1675_s16 = smov [#allocation9]   ;;  %s434_s4 = int_to_ptr.hbm [resolvable:$true] %s433_s4 }
  0x19   : > { %s411_s19 = sshll.u32 %s1675_s16, 4  ;;  %s1676_s17 = smov [#allocation12]   ;;  %s412_s19 = int_to_ptr.vmem [resolvable:$true] %s411_s19 }
  0x1a   : > { %1318 = dma.hbm_to_vmem [thread:$0]  (!%p1788_p5), %s410_s14, 16, %s412_s19, [#allocation8]  }
  0x1b   : > { %s435_s20 = sshll.u32 %s1676_s17, 4  ;;  %s445_s24 = sshll.u32 %s1993_s12, 4  ;;  %s436_s20 = int_to_ptr.vmem [resolvable:$true] %s435_s20  ;;  %s446_s24 = int_to_ptr.hbm [resolvable:$true] %s445_s24 }
  0x1c   : > { %1324 = dma.hbm_to_vmem [thread:$0]  (!%p1788_p5), %s434_s4, 16, %s436_s20, [#allocation11]  }
  0x1d   : > { %s1677_s23 = smov [#allocation13]   ;;  %467 = sbr.rel (%p1774_p3) target bundleno = 2290 (0x8f2), region = 72 }
  0x1e   : > { %s447_s18 = sshll.u32 %s1677_s23, 4  ;;  %s448_s18 = int_to_ptr.vmem [resolvable:$true] %s447_s18 }
  0x1f   : > { %1327 = dma.hbm_to_vmem [thread:$0]  (!%p1788_p5), %s446_s24, 16, %s448_s18, [#allocation14]  }
  0x22   : > { %1647 = dma.done.wait (%p1328_p2), [#allocation3], 16  }
  0x23   : > { %1649 = vsyncadd (%p1328_p2), [#allocation3], 4294967280 }
  0x24   : > { %1651 = dma.done.wait (%p1328_p2), [#allocation5], 32  }
  0x25   : > { %1653 = vsyncadd (%p1328_p2), [#allocation5], 4294967264 }
  0x26   : > { %1655 = dma.done.wait (%p1328_p2), [#allocation8], 32  }
  0x27   : > { %1657 = vsyncadd (%p1328_p2), [#allocation8], 4294967264 }
  0x28   : > { %1659 = dma.done.wait (%p1328_p2), [#allocation11], 32  }
  0x29   : > { %1661 = vsyncadd (%p1328_p2), [#allocation11], 4294967264 }
  0x2a   : > { %1663 = dma.done.wait (%p1328_p2), [#allocation14], 16  }
  0x2b   : > { %1665 = vsyncadd (%p1328_p2), [#allocation14], 4294967280  ;;  %p545_p6 = scmp.lt.s32.totalorder %s1769_s29, 1  ;;  %v557_v0 = vld [vmem:[%s1982_s1 + $0x18] sm:$0xff]  ;;  %v556_v1 = vld [vmem:[%s1982_s1 + $0x10] sm:$0xff]  ;;  %vm562_vm0 = vcmask 261120  }
  0x2c   : > { %578 = vmatpush.msra.mxu0 %v557_v0  ;;  %v555_v2 = vld [vmem:[%s1982_s1 + $0x8] sm:$0xff]  ;;  %v554_v3 = vld [vmem:[%s1982_s1] sm:$0xff]  ;;  %s1678_s15 = smov 88   ;;  %s1679_s24 = smov 96   ;;  %vm593_vm1 = vcmask 64512   ;;  %vm1037_vm6 = vcmask 523264  }
  0x2d   : > { %s2000_s29 = smov (!%p545_p6, %s1769_s29), 1  ;;  %v1372_v5 = vld [vmem:[#allocation2] ss:$0 sm:$0xff]  ;;  %s1680_s23 = smov 120  }
  0x2e   : > { %s1248_s30 = sshll.u32 %s2000_s29, 3  ;;  %579 = vmatpush.msra.mxu0 %v556_v1  ;;  %s1681_s18 = smov 72   ;;  %v586_v8 = vld [vmem:[%s1984_s3] sm:$0xff] }
  0x2f   : > { %s548_s17 = scalar_lea.vmem %s1981_s0, %s1248_s30  ;;  %s1682_s22 = smov 104   ;;  %763 = vmatpush.msra.mxu3 %v586_v8 }
  0x30   : > { %580 = vmatpush.msra.mxu0 %v555_v2  ;;  %v1867_v4 = vld [vmem:[%s548_s17] sm:$0xff]  ;;  %s1683_s26 = smov 80   ;;  %s1684_s27 = smov 64   ;;  %v587_v2 = vld [vmem:[%s1984_s3 + $0x8] sm:$0xff] }
  0x31   : > { %s1685_s4 = smov 112   ;;  %s1686_s16 = smov 48  }
  0x32   : > { %581 = vmatpush.msra.mxu0 %v554_v3  ;;  %s1687_s19 = smov 56   ;;  %s1688_s17 = smov 40   ;;  %v588_v3 = vld [vmem:[%s1984_s3 + $0x10] sm:$0xff] }
  0x33   : > { %1250 = vmatmul.msk.f32.vlgmr.msra.gmra.mxu0 %vm562_vm0, %v1867_v4 }
  0xb0   : > { %v583_v6 = vpop.f32.mrf.mxu0 }
  0xb1   : > { %v1871_v7 = vadd.f32 %v1372_v5, %v583_v6 }
  0xb3   : > { %658 = vrot.lane.b32.xlu2 %v1871_v7, %s1678_s15  ;;  %591 = vrot.lane.b32.xlu0 %v1871_v7, %s1679_s24  ;;  %s552_s15 = scalar_lea.vmem %s1994_s13, %s1248_s30 }
  0xbb   : > { %656 = vrot.lane.b32.xlu2 %v1871_v7, %s1680_s23 }
  0xc3   : > { %860 = vrot.lane.b32.xlu2 %v1871_v7, %s1681_s18 }
  0xcb   : > { %858 = vrot.lane.b32.xlu2 %v1871_v7, %s1682_s22 }
  0xd3   : > { %770 = vrot.lane.b32.xlu2 %v1871_v7, %s1683_s26 }
 0x10d   : > { %v659_v9 = vpop.permute.xlu2 %658 }
 0x10e   : > { %1254 = vmatpush.xpose.msk.msrb.mxu0 %vm593_vm1, %v659_v9 }
 0x115   : > { %v657_v10 = vpop.permute.xlu2 %656 }
 0x116   : > { %1255 = vmatmul.msk.f32.vlgmr.msrb.gmra.mxu0 %vm593_vm1, %v657_v10 }
 0x11d   : > { %v861_v11 = vpop.permute.xlu2 %860 }
 0x11e   : > { %1263 = vmatpush.xpose.msk.msrb.mxu3 %vm593_vm1, %v861_v11 }
 0x125   : > { %v859_v12 = vpop.permute.xlu2 %858  ;;  %v592_v13 = vpop.permute.xlu0 %591 }
 0x126   : > { %1251 = vmatpush.xpose.msk.msra.mxu1 %vm593_vm1, %v592_v13  ;;  %v1373_v13 = vld [vmem:[#allocation4] ss:$0 sm:$0xff] }
 0x129   : > { %1252 = vmatmul.msk.f32.vlgmr.msra.gmra.mxu1 %vm593_vm1, %v1871_v7 }
 0x12a   : > { %740 = vmatpush.msrb.mxu1 %v587_v2 }
 0x12c   : > { %852 = vmatpush.msra.mxu1 %v588_v3 }
 0x12d   : > { %v771_v14 = vpop.permute.xlu2 %770 }
 0x12e   : > { %1259 = vmatpush.xpose.msk.msra.mxu0 %vm593_vm1, %v771_v14 }
 0x193   : > { %v681_v15 = vpop.f32.mrf.mxu0 }
 0x194   : > { %v684_v16 = vmul.f32 0.35355338, %v681_v15 }
 0x196   : > { %v685_v17 = vsel %vm593_vm1, %v684_v16, -inf }
 0x197   : > { %686 = vmax.xlane.f32.xlu2 %v685_v17 }
 0x1a6   : > { %v615_v18 = vpop.f32.mrf.mxu1 }
 0x1a7   : > { %v618_v19 = vmul.f32 0.35355338, %v615_v18 }
 0x1a9   : > { %v619_v20 = vsel %vm593_vm1, %v618_v19, -inf }
 0x1aa   : > { %620 = vmax.xlane.f32.xlu0 %v619_v20 }
 0x20a   : > { %v687_v35 = vpop.xlane.xlu2 %686 }
 0x20b   : > { %v688_v37 = vsub.f32 %v684_v16, %v687_v35  ;;  %v1031_v35 = vld [vmem:[%s1988_s7 + $0x30] sm:$0xff] }
 0x20d   : > { %v689_v38 = vmul.f32 1.442695, %v688_v37 }
 0x21d   : > { %v621_v21 = vpop.xlane.xlu0 %620 }
 0x21e   : > { %v622_v22 = vsub.f32 %v618_v19, %v621_v21  ;;  %v1689_v19 = vmov 32.0  }
 0x220   : > { %v623_v23 = vmul.f32 1.442695, %v622_v22 }
 0x222   : > { %1380 = vpow2.f32 %v623_v23 }
 0x228   : > { %v1381_v24 = vpop.eup %1380 }
 0x229   : > { %v625_v25 = vsel %vm593_vm1, %v1381_v24, 0.0 }
 0x22a   : > { %626 = vadd.xlane.f32.xlu1 %v625_v25 }
 0x243   : > { %630 = vrot.lane.b32.xlu1 %v1871_v7, %s1684_s27 }
 0x24b   : > { %768 = vrot.lane.b32.xlu1 %v1871_v7, %s1685_s4 }
 0x29d   : > { %v627_v26 = vpop.xlane.xlu1 %626 }
 0x29e   : > { %1382 = vrcp.f32 %v627_v26 }
 0x29f   : > { %1384 = vpow2.f32 %v689_v38 }
 0x2a4   : > { %v1383_v27 = vpop.eup %1382 }
 0x2a5   : > { %v629_v29 = vmul.f32 %v1383_v27, %v1381_v24  ;;  %v1385_v45 = vpop.eup %1384 }
 0x2a6   : > { %v691_v46 = vsel %vm593_vm1, %v1385_v45, 0.0 }
 0x2b5   : > { %v631_v28 = vpop.permute.xlu1 %630 }
 0x2b6   : > { %651 = vmatpush.msra.mxu2 %v631_v28 }
 0x2b7   : > { %1253 = vmatmul.msk.f32.vlgmr.msra.gmra.mxu2 %vm593_vm1, %v629_v29 }
 0x2bd   : > { %v769_v30 = vpop.permute.xlu1 %768 }
 0x2be   : > { %1260 = vmatmul.msk.f32.vlgmr.msra.gmra.mxu0 %vm593_vm1, %v769_v30  ;;  %v996_v30 = vld [vmem:[%s1986_s5 + $0x18] sm:$0xff] }
 0x33a   : > { %v653_v31 = vpop.f32.mrf.mxu2 }
 0x33b   : > { %1258 = vmatmul.msk.f32.vlgmr.msra.gmra.mxu3 %vm593_vm1, %v653_v31  ;;  %v793_v32 = vpop.f32.mrf.mxu0  ;;  %v995_v31 = vld [vmem:[%s1986_s5 + $0x10] sm:$0xff] }
 0x33c   : > { %v796_v33 = vmul.f32 0.35355338, %v793_v32  ;;  %v994_v32 = vld [vmem:[%s1986_s5 + $0x8] sm:$0xff] }
 0x33e   : > { %v797_v34 = vsel %vm593_vm1, %v796_v33, -inf }
 0x33f   : > { %798 = vmax.xlane.f32.xlu1 %v797_v34  ;;  %v1032_v34 = vld [vmem:[%s1988_s7 + $0x38] sm:$0xff] }
 0x340   : > { %1049 = vmatpush.msra.mxu3 %v1032_v34 }
 0x342   : > { %1050 = vmatpush.msra.mxu3 %v1031_v35 }
 0x343   : > { %1264 = vmatmul.msk.f32.vlgmr.msrb.gmra.mxu3 %vm593_vm1, %v859_v12 }
 0x358   : > { %808 = vrot.lane.b32.xlu1 %v1871_v7, %s1686_s16 }
 0x3b2   : > { %v799_v39 = vpop.xlane.xlu1 %798 }
 0x3b3   : > { %v800_v42 = vsub.f32 %v796_v33, %v799_v39  ;;  %v993_v33 = vld [vmem:[%s1986_s5] sm:$0xff] }
 0x3b4   : > { %v1029_v39 = vld [vmem:[%s1988_s7 + $0x20] sm:$0xff] }
 0x3b5   : > { %v801_v44 = vmul.f32 1.442695, %v800_v42 }
 0x3b7   : > { %1386 = vpow2.f32 %v801_v44 }
 0x3bd   : > { %v1387_v47 = vpop.eup %1386 }
 0x3be   : > { %v1900_v36 = vpop.f32.mrf.mxu3  ;;  %v803_v48 = vsel %vm593_vm1, %v1387_v47, 0.0 }
 0x3c6   : > { %v883_v40 = vpop.f32.mrf.mxu3 }
 0x3c7   : > { %v886_v41 = vmul.f32 0.35355338, %v883_v40 }
 0x3c9   : > { %v887_v43 = vsel %vm593_vm1, %v886_v41, -inf }
 0x3ca   : > { %888 = vmax.xlane.f32.xlu0 %v887_v43  ;;  %v809_v59 = vpop.permute.xlu1 %808 }
 0x3d2   : > { %692 = vadd.xlane.f32.xlu0 %v691_v46 }
 0x3da   : > { %804 = vadd.xlane.f32.xlu0 %v803_v48  ;;  %v1374_v48 = vld [vmem:[#allocation9] ss:$0 sm:$0xff] }
 0x3ee   : > { %696 = vrot.lane.b32.xlu0 %v1871_v7, %s1687_s19 }
 0x43d   : > { %v889_v49 = vpop.xlane.xlu0 %888 }
 0x43e   : > { %v890_v50 = vsub.f32 %v886_v41, %v889_v49  ;;  %v1028_v41 = vld [vmem:[%s1988_s7 + $0x18] sm:$0xff] }
 0x440   : > { %v891_v51 = vmul.f32 1.442695, %v890_v50 }
 0x442   : > { %1388 = vpow2.f32 %v891_v51  ;;  %v1375_v51 = vld [vmem:[#allocation10] ss:$0 sm:$0xff] }
 0x445   : > { %v693_v54 = vpop.xlane.xlu0 %692 }
 0x446   : > { %1390 = vrcp.f32 %v693_v54  ;;  %v1027_v54 = vld [vmem:[%s1988_s7 + $0x10] sm:$0xff] }
 0x448   : > { %v1389_v52 = vpop.eup %1388 }
 0x449   : > { %v893_v53 = vsel %vm593_vm1, %v1389_v52, 0.0 }
 0x44a   : > { %894 = vadd.xlane.f32.xlu2 %v893_v53 }
 0x44c   : > { %v1391_v56 = vpop.eup %1390 }
 0x44d   : > { %v805_v55 = vpop.xlane.xlu0 %804  ;;  %v695_v58 = vmul.f32 %v1391_v56, %v1385_v45  ;;  %v1025_v56 = vld [vmem:[%s1988_s7] sm:$0xff] }
 0x44e   : > { %1392 = vrcp.f32 %v805_v55  ;;  %v1026_v55 = vld [vmem:[%s1988_s7 + $0x8] sm:$0xff] }
 0x454   : > { %v1393_v60 = vpop.eup %1392 }
 0x455   : > { %v807_v61 = vmul.f32 %v1393_v60, %v1387_v47 }
 0x460   : > { %v697_v57 = vpop.permute.xlu0 %696 }
 0x461   : > { %717 = vmatpush.msrb.mxu2 %v697_v57  ;;  %v1376_v57 = vld [vmem:[#allocation6] ss:$0 sm:$0xff] }
 0x462   : > { %898 = vrot.lane.b32.xlu2 %v1871_v7, %s1688_s17  ;;  %1256 = vmatmul.msk.f32.vlgmr.msrb.gmra.mxu2 %vm593_vm1, %v695_v58  ;;  %v589_v7 = vld [vmem:[%s1984_s3 + $0x18] sm:$0xff] }
 0x463   : > { %829 = vmatpush.msra.mxu2 %v809_v59 }
 0x465   : > { %942 = vmatpush.msrb.mxu2 %v589_v7 }
 0x46a   : > { %1261 = vmatmul.msk.f32.vlgmr.msra.gmra.mxu2 %vm593_vm1, %v807_v61  ;;  %v1377_v61 = vld [vmem:[#allocation7] ss:$0 sm:$0xff] }
 0x4bd   : > { %v895_v62 = vpop.xlane.xlu2 %894 }
 0x4be   : > { %1394 = vrcp.f32 %v895_v62 }
 0x4bf   : > { %1396 = vrcp.f32 %v1689_v19  ;;  %v1379_v19 = vld [vmem:[#allocation13] ss:$0 sm:$0xff] }
 0x4c4   : > { %v1395_v63 = vpop.eup %1394 }
 0x4c5   : > { %v897_v0 = vmul.f32 %v1395_v63, %v1389_v52  ;;  %v899_v1 = vpop.permute.xlu2 %898  ;;  %v1397_v20 = vpop.eup %1396 }
 0x4c6   : > { %919 = vmatpush.msrb.mxu0 %v899_v1  ;;  %v960_v21 = vmul.f32 32.0, %v1397_v20  ;;  %vm964_vm2 = vweird.f32 %v1397_v20 }
 0x4c7   : > { %1265 = vmatmul.msk.f32.vlgmr.msrb.gmra.mxu0 %vm593_vm1, %v897_v0 }
 0x4c8   : > { %v961_v22 = vsub.f32 1.0, %v960_v21 }
 0x4ca   : > { %v962_v23 = vmul.f32 %v1397_v20, %v961_v22 }
 0x4cc   : > { %v963_v24 = vadd.f32 %v1397_v20, %v962_v23 }
 0x4ce   : > { %v1926_v25 = vsel %vm964_vm2, %v1397_v20, %v963_v24 }
 0x4e5   : > { %v719_v5 = vpop.f32.mrf.mxu2 }
 0x4e6   : > { %1257 = vmatmul.msk.f32.vlgmr.msrb.gmra.mxu1 %vm593_vm1, %v719_v5 }
 0x4e7   : > { %1016 = vmatpush.msrb.mxu1 %v996_v30 }
 0x4e9   : > { %1017 = vmatpush.msrb.mxu1 %v995_v31 }
 0x4eb   : > { %1018 = vmatpush.msrb.mxu1 %v994_v32 }
 0x4ed   : > { %v831_v6 = vpop.f32.mrf.mxu2  ;;  %1019 = vmatpush.msrb.mxu1 %v993_v33 }
 0x4ee   : > { %1262 = vmatmul.msk.f32.vlgmr.msra.gmra.mxu1 %vm593_vm1, %v831_v6 }
 0x544   : > { %v921_v8 = vpop.f32.mrf.mxu0 }
 0x545   : > { %1266 = vmatmul.msk.f32.vlgmr.msrb.gmra.mxu2 %vm593_vm1, %v921_v8 }
 0x563   : > { %v742_v9 = vpop.f32.mrf.mxu1 }
 0x564   : > { %v766_v11 = vadd.f32 %v1900_v36, %v742_v9  ;;  %v1030_v36 = vld [vmem:[%s1988_s7 + $0x28] sm:$0xff] }
 0x565   : > { %1051 = vmatpush.msra.mxu3 %v1030_v36 }
 0x567   : > { %1052 = vmatpush.msra.mxu3 %v1029_v39 }
 0x569   : > { %1053 = vmatpush.msra.mxu3 %v1028_v41 }
 0x56b   : > { %v854_v10 = vpop.f32.mrf.mxu1  ;;  %1054 = vmatpush.msra.mxu3 %v1027_v54 }
 0x56c   : > { %v857_v12 = vadd.f32 %v854_v10, %v766_v11 }
 0x56d   : > { %1055 = vmatpush.msra.mxu3 %v1026_v55 }
 0x56f   : > { %1056 = vmatpush.msra.mxu3 %v1025_v56 }
 0x5c8   : > { %v944_v14 = vpop.f32.mrf.mxu2 }
 0x5c9   : > { %v947_v15 = vadd.f32 %v944_v14, %v857_v12 }
 0x5cb   : > { %v952_v16 = vadd.f32 %v1373_v13, %v947_v15 }
 0x5cd   : > { %v953_v17 = vadd.f32 %v952_v16, %v1867_v4 }
 0x5cf   : > { %v956_v18 = vsel %vm562_vm0, %v953_v17, 0.0 }
 0x5d0   : > { %957 = vadd.xlane.f32.xlu0 %v956_v18 }
 0x643   : > { %v958_v26 = vpop.xlane.xlu0 %957 }
 0x644   : > { %v966_v27 = vmul.f32 %v1926_v25, %v958_v26 }
 0x646   : > { %v967_v28 = vsub.f32 %v953_v17, %v966_v27  ;;  %v1378_v17 = vld [vmem:[#allocation12] ss:$0 sm:$0xff] }
 0x648   : > { %v968_v29 = vmul.f32 %v967_v28, %v967_v28 }
 0x64a   : > { %v969_v4 = vsel %vm562_vm0, %v968_v29, 0.0 }
 0x64b   : > { %970 = vadd.xlane.f32.xlu1 %v969_v4 }
 0x6be   : > { %v971_v37 = vpop.xlane.xlu1 %970 }
 0x6bf   : > { %v972_v38 = vmul.f32 %v971_v37, %v1926_v25 }
 0x6c1   : > { %v973_v40 = vadd.f32 1e-05, %v972_v38 }
 0x6c3   : > { %1398 = vrsqrt.f32 %v973_v40  ;;  %vm980_vm4 = vweird.f32 %v973_v40 }
 0x6c9   : > { %v1399_v42 = vpop.eup %1398 }
 0x6ca   : > { %v975_v43 = vmul.f32 %v1399_v42, %v973_v40  ;;  %vm981_vm3 = vweird.f32 %v1399_v42 }
 0x6cb   : > { %vm982_vm5 = vmor %vm980_vm4, %vm981_vm3 }
 0x6cc   : > { %v976_v44 = vmul.f32 %v1399_v42, %v975_v43 }
 0x6ce   : > { %v977_v45 = vmul.f32 0.5, %v976_v44 }
 0x6d0   : > { %v978_v46 = vsub.f32 1.5, %v977_v45 }
 0x6d2   : > { %v979_v47 = vmul.f32 %v1399_v42, %v978_v46 }
 0x6d4   : > { %v983_v49 = vsel %vm982_vm5, %v1399_v42, %v979_v47 }
 0x6d5   : > { %v984_v50 = vmul.f32 %v983_v49, %v967_v28 }
 0x6d7   : > { %v988_v52 = vmul.f32 %v1374_v48, %v984_v50 }
 0x6d9   : > { %v992_v53 = vadd.f32 %v1375_v51, %v988_v52 }
 0x6db   : > { %1267 = vmatmul.msk.f32.vlgmr.msrb.gmra.mxu1 %vm562_vm0, %v992_v53 }
 0x758   : > { %v1021_v58 = vpop.f32.mrf.mxu1 }
 0x759   : > { %v1022_v59 = vadd.f32 %v1376_v57, %v1021_v58 }
 0x75b   : > { %v1024_v60 = vmax.f32 %v1022_v59, 0.0 }
 0x75d   : > { %1268 = vmatmul.msk.f32.vlgmr.msra.gmra.mxu3 %vm1037_vm6, %v1024_v60 }
 0x7e0   : > { %v1058_v62 = vpop.f32.mrf.mxu3 }
 0x7e1   : > { %v1059_v63 = vadd.f32 %v1377_v61, %v1058_v62 }
 0x7e3   : > { %v1061_v0 = vadd.f32 %v1059_v63, %v992_v53 }
 0x7e5   : > { %v1064_v1 = vsel %vm562_vm0, %v1061_v0, 0.0 }
 0x7e6   : > { %1065 = vadd.xlane.f32.xlu2 %v1064_v1 }
 0x859   : > { %v1066_v2 = vpop.xlane.xlu2 %1065 }
 0x85a   : > { %v1067_v3 = vmul.f32 %v1066_v2, %v1926_v25 }
 0x85c   : > { %v1068_v5 = vsub.f32 %v1061_v0, %v1067_v3 }
 0x85e   : > { %v1069_v6 = vmul.f32 %v1068_v5, %v1068_v5 }
 0x860   : > { %v1070_v7 = vsel %vm562_vm0, %v1069_v6, 0.0 }
 0x861   : > { %1071 = vadd.xlane.f32.xlu0 %v1070_v7 }
 0x8d4   : > { %v1072_v8 = vpop.xlane.xlu0 %1071 }
 0x8d5   : > { %v1073_v9 = vmul.f32 %v1072_v8, %v1926_v25 }
 0x8d7   : > { %v1074_v10 = vadd.f32 1e-05, %v1073_v9 }
 0x8d9   : > { %1400 = vrsqrt.f32 %v1074_v10  ;;  %vm1081_vm8 = vweird.f32 %v1074_v10 }
 0x8df   : > { %v1401_v11 = vpop.eup %1400 }
 0x8e0   : > { %v1076_v12 = vmul.f32 %v1401_v11, %v1074_v10  ;;  %vm1082_vm7 = vweird.f32 %v1401_v11 }
 0x8e1   : > { %vm1083_vm9 = vmor %vm1081_vm8, %vm1082_vm7 }
 0x8e2   : > { %v1077_v13 = vmul.f32 %v1401_v11, %v1076_v12 }
 0x8e4   : > { %v1078_v14 = vmul.f32 0.5, %v1077_v13 }
 0x8e6   : > { %v1079_v15 = vsub.f32 1.5, %v1078_v14 }
 0x8e8   : > { %v1080_v16 = vmul.f32 %v1401_v11, %v1079_v15 }
 0x8ea   : > { %v1084_v18 = vsel %vm1083_vm9, %v1401_v11, %v1080_v16 }
 0x8eb   : > { %v1085_v20 = vmul.f32 %v1084_v18, %v1068_v5 }
 0x8ed   : > { %v1089_v21 = vmul.f32 %v1378_v17, %v1085_v20 }
 0x8ef   : > { %v1093_v22 = vadd.f32 %v1379_v19, %v1089_v21 }
 0x8f1   : > { %1094 = vst.msk [vmem:[%s552_s15] sm:$0xff] %vm562_vm0, %v1093_v22 }
 0x8f2 PF: > { %s28_s25 = sadd.s32 1, %s1668_s25  }
 0x8f3   : > { %p25_p7 = scmp.ge.s32.totalorder %s28_s25, 4  }
 0x8f5   :  { %27 = sbr.rel (!%p25_p7) target bundleno = 7 (0x7), region = 135 }
 0x8fa   :  { %1114 = vsyncpa [#allocation3], 1 }
 0x8fb   :  { %1116 = vsyncpa [#allocation3 + $0x1], 1 }
 0x8fc   :  { %1117 = vsyncpa [#allocation5], 1 }
 0x8fd   :  { %1118 = vsyncpa [#allocation8], 1 }
 0x8fe   :  { %1119 = vsyncpa [#allocation11], 1 }
 0x8ff   :  { %1120 = vsyncpa [#allocation14], 1 }

</bundles_post_ra>
